<compile_context>
chip_gen: v6e
topology: v6e:2x2x1
jax: 0.10.0
libtpu: 0.0.40
codegen_flags: <defaults>
</compile_context>

<pallas_src>
import functools
import math

import jax
import jax.numpy as jnp
from jax.experimental import pallas as pl
from jax.experimental.pallas import tpu as pltpu


DTYPE = jnp.bfloat16          # storage / MXU operand dtype
ACC = jnp.float32             # accumulation / stats dtype
_MIB = 1024 * 1024


# ----------------------------------------------------------------------------
# Small helpers
# ----------------------------------------------------------------------------

def _round_up(x, m):
    return ((x + m - 1) // m) * m


def _largest_divisor_tile(m, cap):
    """Largest multiple-of-16 (then -8) divisor of m that is <= cap (guarded)."""
    cap = max(8, min(cap, m))
    for step in (16, 8):
        start = cap - (cap % step)
        for t in range(start, step - 1, -step):
            if m % t == 0:
                return t
    if m <= cap:           # guarded fallback: only take full extent when it is small
        return m
    raise ValueError(f"no row tile <= {cap} divides M={m}; pad M to a multiple of 16")


def _clamp_vmem(est_bytes):
    """Explicit scoped-VMEM request: 2x the working-set estimate, kept < v7x's 64MiB."""
    return int(min(max(2 * est_bytes, 32 * _MIB), 48 * _MIB))


def _layernorm_f32(x, gamma, beta, eps=1e-5):
    mu = jnp.mean(x, axis=-1, keepdims=True)
    xc = x - mu
    var = jnp.mean(xc * xc, axis=-1, keepdims=True)   # biased, like nn.LayerNorm
    return xc * jax.lax.rsqrt(var + eps) * gamma + beta


def _gelu(x):
    # TODO(synk): PyTorch nn.GELU() defaults to the exact erf form; tanh approximation
    # used here (max abs diff ~1e-3) because it maps cleanly onto the EUP.
    return jax.nn.gelu(x, approximate=True)


# ----------------------------------------------------------------------------
# Kernel 1: fused pre-LN attention residual block
#   out = x + c_proj(MHSA(ln_1(x)))
#   grid = (B, N // tq, heads); heads is the accumulated ("arbitrary") axis.
# ----------------------------------------------------------------------------

def _attn_block_kernel(xq_ref, xf_ref, g_ref, bt_ref, wq_ref, bq_ref, wkv_ref,
                       bkv_ref, wo_ref, bo_ref, o_ref, acc_ref, *, dh_pad):
    h = pl.program_id(2)

    g = g_ref[...].astype(ACC)
    bt = bt_ref[...].astype(ACC)

    # Residual q-row tile and its LayerNorm.
    xq = xq_ref[...].astype(ACC)                               # (tq, W) f32
    xq_n = _layernorm_f32(xq, g, bt).astype(DTYPE)

    # Full-sequence LayerNorm feeding this head's K/V projection (cheap VPU work
    # compared to the HBM round trip of a materialized qkv it replaces).
    xf_n = _layernorm_f32(xf_ref[...].astype(ACC), g, bt).astype(DTYPE)   # (N, W)

    # Per-head projections. 1/sqrt(dh) is pre-folded into wq/bq; the head dim is
    # zero-padded to dh_pad (128-lane multiple) so the slices below are free,
    # lane-aligned views and the contractions are fully aligned on the MXU.
    q = (jnp.dot(xq_n, wq_ref[...], preferred_element_type=ACC)
         + bq_ref[...].astype(ACC)).astype(DTYPE)              # (tq, dh_pad)
    kv = (jnp.dot(xf_n, wkv_ref[...], preferred_element_type=ACC)
          + bkv_ref[...].astype(ACC))                          # (N, 2*dh_pad) f32
    k = kv[:, :dh_pad].astype(DTYPE)
    v = kv[:, dh_pad:].astype(DTYPE)

    s = jax.lax.dot_general(q, k, (((1,), (1,)), ((), ())),
                            preferred_element_type=ACC)        # (tq, N) f32
    s = s - jnp.max(s, axis=-1, keepdims=True)
    p = jnp.exp(s)
    p = p * pl.reciprocal(jnp.sum(p, axis=-1, keepdims=True), approx=True)  # EUP slot
    pv = jnp.dot(p.astype(DTYPE), v, preferred_element_type=ACC)            # (tq, dh_pad)

    # Per-head output-projection accumulation (no H-way lane concat): this head's
    # rows of W_o arrive as their own zero-padded (dh_pad, W) block.
    contrib = jnp.dot(pv.astype(DTYPE), wo_ref[...], preferred_element_type=ACC)

    @pl.when(h == 0)
    def _():
        acc_ref[...] = xq + bo_ref[...].astype(ACC)            # residual + c_proj bias

    acc_ref[...] += contrib

    @pl.when(h == pl.num_programs(2) - 1)
    def _():
        o_ref[...] = acc_ref[...].astype(o_ref.dtype)


def _pick_q_tile(n, score_budget_bytes=8 * _MIB):
    """q-row tile: bound the live f32 (tq, N) score block to ~score_budget."""
    cap = max(16, score_budget_bytes // max(4 * n, 1))
    return _largest_divisor_tile(n, cap)


def _attn_vmem_bytes(n, tq, w, dh_pad):
    return (n * w * 2                                   # resident full-x block (bf16)
            + 2 * 2 * tq * w * 2                        # q-tile in + out, double-buffered
            + 2 * 2 * (3 * w * dh_pad + dh_pad * w) * 2  # per-head weights, dbl-buffered
            + 2 * tq * n * 4                            # scores / probabilities (f32)
            + n * 2 * dh_pad * 4                        # kv (f32)
            + 2 * n * w * 4                             # LayerNorm temporaries (f32)
            + 2 * tq * w * 4)                           # accumulator + contribution


def pallas_attention_block(x, gamma, beta, wq, bq, wkv, bkv, wo, bo):
    """x:(B,N,W) bf16 -> x + c_proj(MHSA(ln_1(x))), fully fused.

    wq :(H, W, dh_pad)   bf16  (1/sqrt(dh) folded in, zero-padded columns)
    bq :(H, 1, dh_pad)   f32
    wkv:(H, W, 2*dh_pad) bf16  (k | v, zero-padded columns)
    bkv:(H, 1, 2*dh_pad) f32
    wo :(H, dh_pad, W)   bf16  (zero-padded rows)
    bo :(1, W)           f32
    """
    B, N, W = x.shape
    H, _, dh_pad = wq.shape
    assert N % 8 == 0, "num_latents must be a multiple of 8"
    tq = _pick_q_tile(N)
    n_qt = N // tq

    kernel = functools.partial(_attn_block_kernel, dh_pad=dh_pad)
    vmem_limit = _clamp_vmem(_attn_vmem_bytes(N, tq, W, dh_pad))

    return pl.pallas_call(
        kernel,
        out_shape=jax.ShapeDtypeStruct((B, N, W), DTYPE),
        grid=(B, n_qt, H),
        in_specs=[
            pl.BlockSpec((None, tq, W), lambda b, i, h: (b, i, 0)),       # q-row tile of x
            pl.BlockSpec((None, N, W), lambda b, i, h: (b, 0, 0)),        # full x (resident per b)
            pl.BlockSpec((1, W), lambda b, i, h: (0, 0)),                 # ln_1 gamma
            pl.BlockSpec((1, W), lambda b, i, h: (0, 0)),                 # ln_1 beta
            pl.BlockSpec((None, W, dh_pad), lambda b, i, h: (h, 0, 0)),   # Wq[h]
            pl.BlockSpec((None, 1, dh_pad), lambda b, i, h: (h, 0, 0)),   # bq[h]
            pl.BlockSpec((None, W, 2 * dh_pad), lambda b, i, h: (h, 0, 0)),  # Wkv[h]
            pl.BlockSpec((None, 1, 2 * dh_pad), lambda b, i, h: (h, 0, 0)),  # bkv[h]
            pl.BlockSpec((None, dh_pad, W), lambda b, i, h: (h, 0, 0)),   # Wo[h]
            pl.BlockSpec((1, W), lambda b, i, h: (0, 0)),                 # bo
        ],
        out_specs=pl.BlockSpec((None, tq, W), lambda b, i, h: (b, i, 0)),
        scratch_shapes=[pltpu.VMEM((tq, W), ACC)],
        compiler_params=pltpu.CompilerParams(
            dimension_semantics=("parallel", "parallel", "arbitrary"),
            vmem_limit_bytes=vmem_limit),
    )(x, x, gamma, beta, wq, bq, wkv, bkv, wo, bo)


# ----------------------------------------------------------------------------
# Kernel 2: fused pre-LN MLP residual block: x + c_proj(GELU(c_fc(ln_2(x))))
# ----------------------------------------------------------------------------

def _mlp_block_kernel(x_ref, g_ref, bt_ref, w1_ref, b1_ref, w2_ref, b2_ref, o_ref):
    x = x_ref[...].astype(ACC)
    hn = _layernorm_f32(x, g_ref[...].astype(ACC), bt_ref[...].astype(ACC))
    a = jnp.dot(hn.astype(DTYPE), w1_ref[...], preferred_element_type=ACC)
    a = _gelu(a + b1_ref[...].astype(ACC))
    y = jnp.dot(a.astype(DTYPE), w2_ref[...], preferred_element_type=ACC)
    y = y + b2_ref[...].astype(ACC) + x                                   # residual (f32)
    o_ref[...] = y.astype(o_ref.dtype)


def _pick_mlp_tile(m, w, wh, budget=40 * _MIB):
    """Row tile: multiple of 16, up to 512, sized so weights + f32 hidden fit VMEM."""
    weight_bytes = 2 * (w * wh + wh * w)               # bf16 weights, grid-invariant
    per_row = wh * 4 * 2 + w * (2 * 2 * 2 + 4 * 2)     # f32 hidden x2 + bf16 io + f32 temps
    avail = max(budget - weight_bytes, 2 * _MIB)
    cap = max(16, min(512, avail // max(per_row, 1)))
    return _largest_divisor_tile(m, cap)


def _mlp_vmem_bytes(tm, w, wh):
    return (2 * (w * wh + wh * w)          # bf16 weights (resident)
            + 2 * 2 * tm * w * 2           # x in + out, double-buffered bf16
            + 2 * tm * wh * 4              # hidden f32 (pre / post GELU)
            + 2 * tm * w * 4)              # f32 LN temp + residual


def pallas_mlp_block(x, gamma, beta, w1, b1, w2, b2):
    """x:(M,W) -> x + W2 @ GELU(W1 @ LN(x)); the (M, 4W) hidden never leaves VMEM."""
    M, W = x.shape
    Wh = w1.shape[1]
    tm = _pick_mlp_tile(M, W, Wh)
    vmem_limit = _clamp_vmem(_mlp_vmem_bytes(tm, W, Wh))
    return pl.pallas_call(
        _mlp_block_kernel,
        out_shape=jax.ShapeDtypeStruct((M, W), DTYPE),
        grid=(M // tm,),
        in_specs=[
            pl.BlockSpec((tm, W), lambda i: (i, 0)),
            pl.BlockSpec((1, W), lambda i: (0, 0)),
            pl.BlockSpec((1, W), lambda i: (0, 0)),
            pl.BlockSpec((W, Wh), lambda i: (0, 0)),
            pl.BlockSpec((1, Wh), lambda i: (0, 0)),
            pl.BlockSpec((Wh, W), lambda i: (0, 0)),
            pl.BlockSpec((1, W), lambda i: (0, 0)),
        ],
        out_specs=pl.BlockSpec((tm, W), lambda i: (i, 0)),
        compiler_params=pltpu.CompilerParams(
            dimension_semantics=("parallel",),
            vmem_limit_bytes=vmem_limit),
    )(x, gamma, beta, w1, b1, w2, b2)


# ----------------------------------------------------------------------------
# Parameter construction (deterministic, synthetic) + kernel-layout preparation
# ----------------------------------------------------------------------------

def _init_linear(key, din, dout, scale=0.02):
    kw, kb = jax.random.split(key)
    w = jax.random.normal(kw, (din, dout), jnp.float32) * scale
    b = jax.random.normal(kb, (dout,), jnp.float32) * scale
    return w, b


def _prep_attn(w_qkv, b_qkv, w_o, b_o, *, heads):
    """Re-lay PyTorch-style c_qkv/c_proj weights into lane-aligned per-head blocks.

    PyTorch QKVMultiheadAttention layout: c_qkv output columns grouped per head as
    [q(dh) | k(dh) | v(dh)]; c_proj input rows grouped per head. Here each head's
    dh is zero-padded to a 128-lane multiple and the 1/sqrt(dh) scale is folded
    into the q weights/bias.
    """
    W = w_qkv.shape[0]
    dh = W // heads
    dh_pad = _round_up(max(dh, 128), 128)
    pad = dh_pad - dh
    scale = 1.0 / math.sqrt(dh)

    wh = w_qkv.reshape(W, heads, 3, dh)
    bh = b_qkv.reshape(heads, 3, dh)
    wq, wk, wv = wh[:, :, 0, :] * scale, wh[:, :, 1, :], wh[:, :, 2, :]
    bq, bk, bv = bh[:, 0, :] * scale, bh[:, 1, :], bh[:, 2, :]

    def pad_last(a):
        return jnp.pad(a, [(0, 0)] * (a.ndim - 1) + [(0, pad)])

    wq_p = jnp.transpose(pad_last(wq), (1, 0, 2)).astype(DTYPE)           # (H, W, dh_pad)
    wkv_p = jnp.concatenate([pad_last(wk), pad_last(wv)], axis=-1)
    wkv_p = jnp.transpose(wkv_p, (1, 0, 2)).astype(DTYPE)                 # (H, W, 2*dh_pad)
    bq_p = pad_last(bq)[:, None, :].astype(ACC)                           # (H, 1, dh_pad)
    bkv_p = jnp.concatenate([pad_last(bk), pad_last(bv)], axis=-1)[:, None, :].astype(ACC)

    wo_p = w_o.reshape(heads, dh, W)
    wo_p = jnp.pad(wo_p, ((0, 0), (0, pad), (0, 0))).astype(DTYPE)        # (H, dh_pad, W)
    bo_p = b_o.reshape(1, W).astype(ACC)
    return dict(wq=wq_p, bq=bq_p, wkv=wkv_p, bkv=bkv_p, wo=wo_p, bo=bo_p)


def init_shape_vae_params(key, *, embed_dim, width, heads, num_decoder_layers):
    assert width % heads == 0
    keys = jax.random.split(key, 1 + 4 * num_decoder_layers)
    wkl, bkl = _init_linear(keys[0], embed_dim, width)
    params = {
        "post_kl": (wkl.astype(ACC), bkl.reshape(1, width).astype(ACC)),
        "layers": [],
    }
    for l in range(num_decoder_layers):
        k0, k1, k2, k3 = keys[1 + 4 * l: 1 + 4 * (l + 1)]
        w_qkv, b_qkv = _init_linear(k0, width, 3 * width)   # qkv_bias=True
        w_o, b_o = _init_linear(k1, width, width)
        w1, b1 = _init_linear(k2, width, 4 * width)
        w2, b2 = _init_linear(k3, 4 * width, width)
        params["layers"].append({
            "ln_1": (jnp.ones((1, width), ACC), jnp.zeros((1, width), ACC)),
            "attn": _prep_attn(w_qkv, b_qkv, w_o, b_o, heads=heads),
            "ln_2": (jnp.ones((1, width), ACC), jnp.zeros((1, width), ACC)),
            "mlp": {
                "w1": w1.astype(DTYPE), "b1": b1.reshape(1, -1).astype(ACC),
                "w2": w2.astype(DTYPE), "b2": b2.reshape(1, -1).astype(ACC),
            },
        })
    return params


# ----------------------------------------------------------------------------
# Forward pass: ShapeVAE.forward == post_kl -> Transformer
# ----------------------------------------------------------------------------

def shape_vae_forward(params, latents):
    """latents:(B, num_latents, embed_dim) -> (B, num_latents, width)."""
    B, N, _ = latents.shape
    wkl, bkl = params["post_kl"]
    W = wkl.shape[1]

    # post_kl: K = embed_dim contraction leaves the MXU ~idle; per the perf review
    # this tiny projection is left to plain XLA instead of a dedicated pallas_call.
    x = (latents.astype(ACC) @ wkl + bkl).astype(DTYPE)                    # (B, N, W)

    for layer in params["layers"]:
        g1, bt1 = layer["ln_1"]
        a = layer["attn"]
        x = pallas_attention_block(x, g1, bt1, a["wq"], a["bq"], a["wkv"],
                                   a["bkv"], a["wo"], a["bo"])             # (B, N, W)

        g2, bt2 = layer["ln_2"]
        m = layer["mlp"]
        x2 = pallas_mlp_block(x.reshape(B * N, W), g2, bt2,
                              m["w1"], m["b1"], m["w2"], m["b2"])          # (B*N, W)
        x = x2.reshape(B, N, W)

    return x.astype(jnp.float32)


# ----------------------------------------------------------------------------
# Main
# ----------------------------------------------------------------------------

if __name__ == "__main__":
    # Small, module-consistent config. width=128 keeps every output lane-dense
    # (128-multiple), matching the real ShapeVAE widths (768 / 1024).
    B = 2
    num_latents = 16
    embed_dim = 8
    width = 128
    heads = 4
    num_decoder_layers = 2

    root = jax.random.PRNGKey(0)
    k_params, k_input = jax.random.split(root)

    params = init_shape_vae_params(
        k_params,
        embed_dim=embed_dim,
        width=width,
        heads=heads,
        num_decoder_layers=num_decoder_layers,
    )

    # ShapeVAE.forward input: latents of shape (B, num_latents, embed_dim)
    latents = jax.random.normal(k_input, (B, num_latents, embed_dim), jnp.float32)

    fwd = jax.jit(shape_vae_forward)
    out = jax.block_until_ready(fwd(params, latents))

    assert out.shape == (B, num_latents, width), out.shape
    assert bool(jnp.all(jnp.isfinite(out)))
    print("KERNEL_OK")
</pallas_src>

<mosaic_0001>
module attributes {stable_mosaic.version = 11 : i64} {
  func.func @_attn_block_kernel(%arg0: i32, %arg1: i32, %arg2: i32, %arg3: memref<1x16x128xbf16, #tpu.memory_space<vmem>>, %arg4: memref<1x16x128xbf16, #tpu.memory_space<vmem>>, %arg5: memref<1x128xf32, #tpu.memory_space<vmem>>, %arg6: memref<1x128xf32, #tpu.memory_space<vmem>>, %arg7: memref<1x128x128xbf16, #tpu.memory_space<vmem>>, %arg8: memref<1x1x128xf32, #tpu.memory_space<vmem>>, %arg9: memref<1x128x256xbf16, #tpu.memory_space<vmem>>, %arg10: memref<1x1x256xf32, #tpu.memory_space<vmem>>, %arg11: memref<1x128x128xbf16, #tpu.memory_space<vmem>>, %arg12: memref<1x128xf32, #tpu.memory_space<vmem>>, %arg13: memref<1x16x128xbf16, #tpu.memory_space<vmem>>, %arg14: memref<16x128xf32, #tpu.memory_space<vmem>>) attributes {dimension_semantics = [#tpu.dimension_semantics<parallel>, #tpu.dimension_semantics<parallel>, #tpu.dimension_semantics<arbitrary>], iteration_bounds = array<i64: 2, 1, 4>, scalar_prefetch = 0 : i64, scratch_operands = 1 : i64, tpu.core_type = #tpu.core_type<tc>, window_params = [{transform_indices = @transform_0, window_bounds = array<i64: 1, 16, 128>}, {transform_indices = @transform_1, window_bounds = array<i64: 1, 16, 128>}, {pipeline_mode = #tpu.pipeline_mode<synchronous>, transform_indices = @transform_2, window_bounds = array<i64: 1, 128>}, {pipeline_mode = #tpu.pipeline_mode<synchronous>, transform_indices = @transform_3, window_bounds = array<i64: 1, 128>}, {transform_indices = @transform_4, window_bounds = array<i64: 1, 128, 128>}, {transform_indices = @transform_5, window_bounds = array<i64: 1, 1, 128>}, {transform_indices = @transform_6, window_bounds = array<i64: 1, 128, 256>}, {transform_indices = @transform_7, window_bounds = array<i64: 1, 1, 256>}, {transform_indices = @transform_8, window_bounds = array<i64: 1, 128, 128>}, {pipeline_mode = #tpu.pipeline_mode<synchronous>, transform_indices = @transform_9, window_bounds = array<i64: 1, 128>}, {transform_indices = @transform_10, window_bounds = array<i64: 1, 16, 128>}]} {
    %c0 = arith.constant 0 : index
    %c0_0 = arith.constant 0 : index
    %0 = vector.load %arg5[%c0, %c0_0] : memref<1x128xf32, #tpu.memory_space<vmem>>, vector<1x128xf32>
    %c0_1 = arith.constant 0 : index
    %c0_2 = arith.constant 0 : index
    %1 = vector.load %arg6[%c0_1, %c0_2] : memref<1x128xf32, #tpu.memory_space<vmem>>, vector<1x128xf32>
    %c0_3 = arith.constant 0 : index
    %c0_4 = arith.constant 0 : index
    %c0_5 = arith.constant 0 : index
    %2 = vector.load %arg3[%c0_3, %c0_4, %c0_5] : memref<1x16x128xbf16, #tpu.memory_space<vmem>>, vector<1x16x128xbf16>
    %3 = vector.shape_cast %2 : vector<1x16x128xbf16> to vector<16x128xbf16>
    %4 = arith.extf %3 : vector<16x128xbf16> to vector<16x128xf32>
    %cst = arith.constant dense<0.000000e+00> : vector<16xf32>
    %5 = vector.multi_reduction <add>, %4, %cst [1] : vector<16x128xf32> to vector<16xf32>
    %6 = vector.shape_cast %5 : vector<16xf32> to vector<16x1xf32>
    %cst_6 = arith.constant 1.280000e+02 : f32
    %7 = vector.broadcast %cst_6 : f32 to vector<16x1xf32>
    %8 = arith.divf %6, %7 : vector<16x1xf32>
    %9 = vector.broadcast %8 : vector<16x1xf32> to vector<16x128xf32>
    %10 = arith.subf %4, %9 : vector<16x128xf32>
    %11 = arith.mulf %10, %10 : vector<16x128xf32>
    %cst_7 = arith.constant dense<0.000000e+00> : vector<16xf32>
    %12 = vector.multi_reduction <add>, %11, %cst_7 [1] : vector<16x128xf32> to vector<16xf32>
    %13 = vector.shape_cast %12 : vector<16xf32> to vector<16x1xf32>
    %cst_8 = arith.constant 1.280000e+02 : f32
    %14 = vector.broadcast %cst_8 : f32 to vector<16x1xf32>
    %15 = arith.divf %13, %14 : vector<16x1xf32>
    %cst_9 = arith.constant 9.99999974E-6 : f32
    %16 = vector.broadcast %cst_9 : f32 to vector<16x1xf32>
    %17 = arith.addf %15, %16 : vector<16x1xf32>
    %18 = math.rsqrt %17 : vector<16x1xf32>
    %19 = vector.broadcast %18 : vector<16x1xf32> to vector<16x128xf32>
    %20 = arith.mulf %10, %19 : vector<16x128xf32>
    %21 = vector.broadcast %0 : vector<1x128xf32> to vector<16x128xf32>
    %22 = arith.mulf %20, %21 : vector<16x128xf32>
    %23 = vector.broadcast %1 : vector<1x128xf32> to vector<16x128xf32>
    %24 = arith.addf %22, %23 : vector<16x128xf32>
    %25 = arith.truncf %24 : vector<16x128xf32> to vector<16x128xbf16>
    %c0_10 = arith.constant 0 : index
    %c0_11 = arith.constant 0 : index
    %c0_12 = arith.constant 0 : index
    %26 = vector.load %arg4[%c0_10, %c0_11, %c0_12] : memref<1x16x128xbf16, #tpu.memory_space<vmem>>, vector<1x16x128xbf16>
    %27 = vector.shape_cast %26 : vector<1x16x128xbf16> to vector<16x128xbf16>
    %28 = arith.extf %27 : vector<16x128xbf16> to vector<16x128xf32>
    %cst_13 = arith.constant dense<0.000000e+00> : vector<16xf32>
    %29 = vector.multi_reduction <add>, %28, %cst_13 [1] : vector<16x128xf32> to vector<16xf32>
    %30 = vector.shape_cast %29 : vector<16xf32> to vector<16x1xf32>
    %cst_14 = arith.constant 1.280000e+02 : f32
    %31 = vector.broadcast %cst_14 : f32 to vector<16x1xf32>
    %32 = arith.divf %30, %31 : vector<16x1xf32>
    %33 = vector.broadcast %32 : vector<16x1xf32> to vector<16x128xf32>
    %34 = arith.subf %28, %33 : vector<16x128xf32>
    %35 = arith.mulf %34, %34 : vector<16x128xf32>
    %cst_15 = arith.constant dense<0.000000e+00> : vector<16xf32>
    %36 = vector.multi_reduction <add>, %35, %cst_15 [1] : vector<16x128xf32> to vector<16xf32>
    %37 = vector.shape_cast %36 : vector<16xf32> to vector<16x1xf32>
    %cst_16 = arith.constant 1.280000e+02 : f32
    %38 = vector.broadcast %cst_16 : f32 to vector<16x1xf32>
    %39 = arith.divf %37, %38 : vector<16x1xf32>
    %cst_17 = arith.constant 9.99999974E-6 : f32
    %40 = vector.broadcast %cst_17 : f32 to vector<16x1xf32>
    %41 = arith.addf %39, %40 : vector<16x1xf32>
    %42 = math.rsqrt %41 : vector<16x1xf32>
    %43 = vector.broadcast %42 : vector<16x1xf32> to vector<16x128xf32>
    %44 = arith.mulf %34, %43 : vector<16x128xf32>
    %45 = vector.broadcast %0 : vector<1x128xf32> to vector<16x128xf32>
    %46 = arith.mulf %44, %45 : vector<16x128xf32>
    %47 = vector.broadcast %1 : vector<1x128xf32> to vector<16x128xf32>
    %48 = arith.addf %46, %47 : vector<16x128xf32>
    %49 = arith.truncf %48 : vector<16x128xf32> to vector<16x128xbf16>
    %c0_18 = arith.constant 0 : index
    %c0_19 = arith.constant 0 : index
    %c0_20 = arith.constant 0 : index
    %50 = vector.load %arg7[%c0_18, %c0_19, %c0_20] : memref<1x128x128xbf16, #tpu.memory_space<vmem>>, vector<1x128x128xbf16>
    %51 = vector.shape_cast %50 : vector<1x128x128xbf16> to vector<128x128xbf16>
    %cst_21 = arith.constant dense<0.000000e+00> : vector<16x128xf32>
    %52 = tpu.matmul %25, %51, %cst_21 {dimension_numbers = #tpu.dot_dimension_numbers<[1], [0], [0], [1], [0, 0, 1, 1], [], []>} : vector<16x128xbf16>, vector<128x128xbf16>, vector<16x128xf32> -> vector<16x128xf32>
    %c0_22 = arith.constant 0 : index
    %c0_23 = arith.constant 0 : index
    %c0_24 = arith.constant 0 : index
    %53 = vector.load %arg8[%c0_22, %c0_23, %c0_24] : memref<1x1x128xf32, #tpu.memory_space<vmem>>, vector<1x1x128xf32>
    %54 = vector.shape_cast %53 : vector<1x1x128xf32> to vector<1x128xf32>
    %55 = vector.broadcast %54 : vector<1x128xf32> to vector<16x128xf32>
    %56 = arith.addf %52, %55 : vector<16x128xf32>
    %57 = arith.truncf %56 : vector<16x128xf32> to vector<16x128xbf16>
    %c0_25 = arith.constant 0 : index
    %c0_26 = arith.constant 0 : index
    %c0_27 = arith.constant 0 : index
    %58 = vector.load %arg9[%c0_25, %c0_26, %c0_27] : memref<1x128x256xbf16, #tpu.memory_space<vmem>>, vector<1x128x256xbf16>
    %59 = vector.shape_cast %58 : vector<1x128x256xbf16> to vector<128x256xbf16>
    %cst_28 = arith.constant dense<0.000000e+00> : vector<16x256xf32>
    %60 = tpu.matmul %49, %59, %cst_28 {dimension_numbers = #tpu.dot_dimension_numbers<[1], [0], [0], [1], [0, 0, 1, 1], [], []>} : vector<16x128xbf16>, vector<128x256xbf16>, vector<16x256xf32> -> vector<16x256xf32>
    %c0_29 = arith.constant 0 : index
    %c0_30 = arith.constant 0 : index
    %c0_31 = arith.constant 0 : index
    %61 = vector.load %arg10[%c0_29, %c0_30, %c0_31] : memref<1x1x256xf32, #tpu.memory_space<vmem>>, vector<1x1x256xf32>
    %62 = vector.shape_cast %61 : vector<1x1x256xf32> to vector<1x256xf32>
    %63 = vector.broadcast %62 : vector<1x256xf32> to vector<16x256xf32>
    %64 = arith.addf %60, %63 : vector<16x256xf32>
    %65 = vector.extract_strided_slice %64 {offsets = [0, 0], sizes = [16, 128], strides = [1, 1]} : vector<16x256xf32> to vector<16x128xf32>
    %66 = arith.truncf %65 : vector<16x128xf32> to vector<16x128xbf16>
    %67 = vector.extract_strided_slice %64 {offsets = [0, 128], sizes = [16, 128], strides = [1, 1]} : vector<16x256xf32> to vector<16x128xf32>
    %68 = arith.truncf %67 : vector<16x128xf32> to vector<16x128xbf16>
    %cst_32 = arith.constant dense<0.000000e+00> : vector<16x16xf32>
    %69 = tpu.matmul %57, %66, %cst_32 {dimension_numbers = #tpu.dot_dimension_numbers<[1], [1], [0], [0], [0, 0, 1, 0], [], []>} : vector<16x128xbf16>, vector<16x128xbf16>, vector<16x16xf32> -> vector<16x16xf32>
    %cst_33 = arith.constant dense<0xFF800000> : vector<16xf32>
    %70 = vector.multi_reduction <maximumf>, %69, %cst_33 [1] : vector<16x16xf32> to vector<16xf32>
    %71 = vector.shape_cast %70 : vector<16xf32> to vector<16x1xf32>
    %72 = vector.broadcast %71 : vector<16x1xf32> to vector<16x16xf32>
    %73 = arith.subf %69, %72 : vector<16x16xf32>
    %74 = math.exp %73 : vector<16x16xf32>
    %cst_34 = arith.constant dense<0.000000e+00> : vector<16xf32>
    %75 = vector.multi_reduction <add>, %74, %cst_34 [1] : vector<16x16xf32> to vector<16xf32>
    %76 = vector.shape_cast %75 : vector<16xf32> to vector<16x1xf32>
    %77 = tpu.reciprocal %76 {approx = true} : vector<16x1xf32> -> vector<16x1xf32>
    %78 = vector.broadcast %77 : vector<16x1xf32> to vector<16x16xf32>
    %79 = arith.mulf %74, %78 : vector<16x16xf32>
    %80 = arith.truncf %79 : vector<16x16xf32> to vector<16x16xbf16>
    %cst_35 = arith.constant dense<0.000000e+00> : vector<16x128xf32>
    %81 = tpu.matmul %80, %68, %cst_35 {dimension_numbers = #tpu.dot_dimension_numbers<[1], [0], [0], [1], [0, 0, 1, 1], [], []>} : vector<16x16xbf16>, vector<16x128xbf16>, vector<16x128xf32> -> vector<16x128xf32>
    %82 = arith.truncf %81 : vector<16x128xf32> to vector<16x128xbf16>
    %c0_36 = arith.constant 0 : index
    %c0_37 = arith.constant 0 : index
    %c0_38 = arith.constant 0 : index
    %83 = vector.load %arg11[%c0_36, %c0_37, %c0_38] : memref<1x128x128xbf16, #tpu.memory_space<vmem>>, vector<1x128x128xbf16>
    %84 = vector.shape_cast %83 : vector<1x128x128xbf16> to vector<128x128xbf16>
    %cst_39 = arith.constant dense<0.000000e+00> : vector<16x128xf32>
    %85 = tpu.matmul %82, %84, %cst_39 {dimension_numbers = #tpu.dot_dimension_numbers<[1], [0], [0], [1], [0, 0, 1, 1], [], []>} : vector<16x128xbf16>, vector<128x128xbf16>, vector<16x128xf32> -> vector<16x128xf32>
    %c0_i32 = arith.constant 0 : i32
    %86 = arith.cmpi eq, %arg2, %c0_i32 : i32
    %87 = arith.extui %86 : i1 to i32
    %c0_i32_40 = arith.constant 0 : i32
    %88 = arith.cmpi ne, %87, %c0_i32_40 : i32
    scf.if %88 {
      %c0_46 = arith.constant 0 : index
      %c0_47 = arith.constant 0 : index
      %95 = vector.load %arg12[%c0_46, %c0_47] : memref<1x128xf32, #tpu.memory_space<vmem>>, vector<1x128xf32>
      %96 = vector.broadcast %95 : vector<1x128xf32> to vector<16x128xf32>
      %97 = arith.addf %4, %96 : vector<16x128xf32>
      %c0_48 = arith.constant 0 : index
      %c0_49 = arith.constant 0 : index
      %98 = vector.load %arg14[%c0_48, %c0_49] : memref<16x128xf32, #tpu.memory_space<vmem>>, vector<16x128xf32>
      tpu.vector_store %arg14[%c0_48, %c0_49], %97 {strides = array<i32>} : memref<16x128xf32, #tpu.memory_space<vmem>>, vector<16x128xf32>,
    } else {
    }
    %c0_41 = arith.constant 0 : index
    %c0_42 = arith.constant 0 : index
    %89 = vector.load %arg14[%c0_41, %c0_42] : memref<16x128xf32, #tpu.memory_space<vmem>>, vector<16x128xf32>
    %90 = arith.addf %89, %85 : vector<16x128xf32>
    %c0_43 = arith.constant 0 : index
    %c0_44 = arith.constant 0 : index
    %91 = vector.load %arg14[%c0_43, %c0_44] : memref<16x128xf32, #tpu.memory_space<vmem>>, vector<16x128xf32>
    tpu.vector_store %arg14[%c0_43, %c0_44], %90 {strides = array<i32>} : memref<16x128xf32, #tpu.memory_space<vmem>>, vector<16x128xf32>,
    %c3_i32 = arith.constant 3 : i32
    %92 = arith.cmpi eq, %arg2, %c3_i32 : i32
    %93 = arith.extui %92 : i1 to i32
    %c0_i32_45 = arith.constant 0 : i32
    %94 = arith.cmpi ne, %93, %c0_i32_45 : i32
    scf.if %94 {
      %c0_46 = arith.constant 0 : index
      %c0_47 = arith.constant 0 : index
      %95 = vector.load %arg14[%c0_46, %c0_47] : memref<16x128xf32, #tpu.memory_space<vmem>>, vector<16x128xf32>
      %96 = arith.truncf %95 : vector<16x128xf32> to vector<16x128xbf16>
      %c0_48 = arith.constant 0 : index
      %c0_49 = arith.constant 0 : index
      %c0_50 = arith.constant 0 : index
      %97 = vector.load %arg13[%c0_48, %c0_49, %c0_50] : memref<1x16x128xbf16, #tpu.memory_space<vmem>>, vector<1x16x128xbf16>
      %98 = vector.shape_cast %97 : vector<1x16x128xbf16> to vector<16x128xbf16>
      %99 = vector.shape_cast %96 : vector<16x128xbf16> to vector<1x16x128xbf16>
      tpu.vector_store %arg13[%c0_48, %c0_49, %c0_50], %99 {strides = array<i32>} : memref<1x16x128xbf16, #tpu.memory_space<vmem>>, vector<1x16x128xbf16>,
    } else {
    }
    return
  }
  func.func @transform_0(%arg0: i32, %arg1: i32, %arg2: i32) -> (i32, i32, i32) {
    %c0_i32 = arith.constant 0 : i32
    %c0_i32_0 = arith.constant 0 : i32
    return %arg0, %arg1, %c0_i32 : i32, i32, i32
  }
  func.func @transform_1(%arg0: i32, %arg1: i32, %arg2: i32) -> (i32, i32, i32) {
    %c0_i32 = arith.constant 0 : i32
    %c0_i32_0 = arith.constant 0 : i32
    %c0_i32_1 = arith.constant 0 : i32
    return %arg0, %c0_i32, %c0_i32_0 : i32, i32, i32
  }
  func.func @transform_2(%arg0: i32, %arg1: i32, %arg2: i32) -> (i32, i32) {
    %c0_i32 = arith.constant 0 : i32
    %c0_i32_0 = arith.constant 0 : i32
    %c0_i32_1 = arith.constant 0 : i32
    return %c0_i32, %c0_i32_0 : i32, i32
  }
  func.func @transform_3(%arg0: i32, %arg1: i32, %arg2: i32) -> (i32, i32) {
    %c0_i32 = arith.constant 0 : i32
    %c0_i32_0 = arith.constant 0 : i32
    %c0_i32_1 = arith.constant 0 : i32
    return %c0_i32, %c0_i32_0 : i32, i32
  }
  func.func @transform_4(%arg0: i32, %arg1: i32, %arg2: i32) -> (i32, i32, i32) {
    %c0_i32 = arith.constant 0 : i32
    %c0_i32_0 = arith.constant 0 : i32
    %c0_i32_1 = arith.constant 0 : i32
    return %arg2, %c0_i32, %c0_i32_0 : i32, i32, i32
  }
  func.func @transform_5(%arg0: i32, %arg1: i32, %arg2: i32) -> (i32, i32, i32) {
    %c0_i32 = arith.constant 0 : i32
    %c0_i32_0 = arith.constant 0 : i32
    %c0_i32_1 = arith.constant 0 : i32
    return %arg2, %c0_i32, %c0_i32_0 : i32, i32, i32
  }
  func.func @transform_6(%arg0: i32, %arg1: i32, %arg2: i32) -> (i32, i32, i32) {
    %c0_i32 = arith.constant 0 : i32
    %c0_i32_0 = arith.constant 0 : i32
    %c0_i32_1 = arith.constant 0 : i32
    return %arg2, %c0_i32, %c0_i32_0 : i32, i32, i32
  }
  func.func @transform_7(%arg0: i32, %arg1: i32, %arg2: i32) -> (i32, i32, i32) {
    %c0_i32 = arith.constant 0 : i32
    %c0_i32_0 = arith.constant 0 : i32
    %c0_i32_1 = arith.constant 0 : i32
    return %arg2, %c0_i32, %c0_i32_0 : i32, i32, i32
  }
  func.func @transform_8(%arg0: i32, %arg1: i32, %arg2: i32) -> (i32, i32, i32) {
    %c0_i32 = arith.constant 0 : i32
    %c0_i32_0 = arith.constant 0 : i32
    %c0_i32_1 = arith.constant 0 : i32
    return %arg2, %c0_i32, %c0_i32_0 : i32, i32, i32
  }
  func.func @transform_9(%arg0: i32, %arg1: i32, %arg2: i32) -> (i32, i32) {
    %c0_i32 = arith.constant 0 : i32
    %c0_i32_0 = arith.constant 0 : i32
    %c0_i32_1 = arith.constant 0 : i32
    return %c0_i32, %c0_i32_0 : i32, i32
  }
  func.func @transform_10(%arg0: i32, %arg1: i32, %arg2: i32) -> (i32, i32, i32) {
    %c0_i32 = arith.constant 0 : i32
    %c0_i32_0 = arith.constant 0 : i32
    return %arg0, %arg1, %c0_i32 : i32, i32, i32
  }
}

module attributes {stable_mosaic.version = 11 : i64} {
  func.func @_mlp_block_kernel(%arg0: i32, %arg1: memref<32x128xbf16, #tpu.memory_space<vmem>>, %arg2: memref<1x128xf32, #tpu.memory_space<vmem>>, %arg3: memref<1x128xf32, #tpu.memory_space<vmem>>, %arg4: memref<128x512xbf16, #tpu.memory_space<vmem>>, %arg5: memref<1x512xf32, #tpu.memory_space<vmem>>, %arg6: memref<512x128xbf16, #tpu.memory_space<vmem>>, %arg7: memref<1x128xf32, #tpu.memory_space<vmem>>, %arg8: memref<32x128xbf16, #tpu.memory_space<vmem>>) attributes {dimension_semantics = [#tpu.dimension_semantics<parallel>], iteration_bounds = array<i64: 1>, scalar_prefetch = 0 : i64, scratch_operands = 0 : i64, tpu.core_type = #tpu.core_type<tc>, window_params = [{transform_indices = @transform_0, window_bounds = array<i64: 32, 128>}, {pipeline_mode = #tpu.pipeline_mode<synchronous>, transform_indices = @transform_1, window_bounds = array<i64: 1, 128>}, {pipeline_mode = #tpu.pipeline_mode<synchronous>, transform_indices = @transform_2, window_bounds = array<i64: 1, 128>}, {pipeline_mode = #tpu.pipeline_mode<synchronous>, transform_indices = @transform_3, window_bounds = array<i64: 128, 512>}, {pipeline_mode = #tpu.pipeline_mode<synchronous>, transform_indices = @transform_4, window_bounds = array<i64: 1, 512>}, {pipeline_mode = #tpu.pipeline_mode<synchronous>, transform_indices = @transform_5, window_bounds = array<i64: 512, 128>}, {pipeline_mode = #tpu.pipeline_mode<synchronous>, transform_indices = @transform_6, window_bounds = array<i64: 1, 128>}, {transform_indices = @transform_7, window_bounds = array<i64: 32, 128>}]} {
    %c0 = arith.constant 0 : index
    %c0_0 = arith.constant 0 : index
    %0 = vector.load %arg1[%c0, %c0_0] : memref<32x128xbf16, #tpu.memory_space<vmem>>, vector<32x128xbf16>
    %1 = arith.extf %0 : vector<32x128xbf16> to vector<32x128xf32>
    %c0_1 = arith.constant 0 : index
    %c0_2 = arith.constant 0 : index
    %2 = vector.load %arg2[%c0_1, %c0_2] : memref<1x128xf32, #tpu.memory_space<vmem>>, vector<1x128xf32>
    %c0_3 = arith.constant 0 : index
    %c0_4 = arith.constant 0 : index
    %3 = vector.load %arg3[%c0_3, %c0_4] : memref<1x128xf32, #tpu.memory_space<vmem>>, vector<1x128xf32>
    %cst = arith.constant dense<0.000000e+00> : vector<32xf32>
    %4 = vector.multi_reduction <add>, %1, %cst [1] : vector<32x128xf32> to vector<32xf32>
    %5 = vector.shape_cast %4 : vector<32xf32> to vector<32x1xf32>
    %cst_5 = arith.constant 1.280000e+02 : f32
    %6 = vector.broadcast %cst_5 : f32 to vector<32x1xf32>
    %7 = arith.divf %5, %6 : vector<32x1xf32>
    %8 = vector.broadcast %7 : vector<32x1xf32> to vector<32x128xf32>
    %9 = arith.subf %1, %8 : vector<32x128xf32>
    %10 = arith.mulf %9, %9 : vector<32x128xf32>
    %cst_6 = arith.constant dense<0.000000e+00> : vector<32xf32>
    %11 = vector.multi_reduction <add>, %10, %cst_6 [1] : vector<32x128xf32> to vector<32xf32>
    %12 = vector.shape_cast %11 : vector<32xf32> to vector<32x1xf32>
    %cst_7 = arith.constant 1.280000e+02 : f32
    %13 = vector.broadcast %cst_7 : f32 to vector<32x1xf32>
    %14 = arith.divf %12, %13 : vector<32x1xf32>
    %cst_8 = arith.constant 9.99999974E-6 : f32
    %15 = vector.broadcast %cst_8 : f32 to vector<32x1xf32>
    %16 = arith.addf %14, %15 : vector<32x1xf32>
    %17 = math.rsqrt %16 : vector<32x1xf32>
    %18 = vector.broadcast %17 : vector<32x1xf32> to vector<32x128xf32>
    %19 = arith.mulf %9, %18 : vector<32x128xf32>
    %20 = vector.broadcast %2 : vector<1x128xf32> to vector<32x128xf32>
    %21 = arith.mulf %19, %20 : vector<32x128xf32>
    %22 = vector.broadcast %3 : vector<1x128xf32> to vector<32x128xf32>
    %23 = arith.addf %21, %22 : vector<32x128xf32>
    %24 = arith.truncf %23 : vector<32x128xf32> to vector<32x128xbf16>
    %c0_9 = arith.constant 0 : index
    %c0_10 = arith.constant 0 : index
    %25 = vector.load %arg4[%c0_9, %c0_10] : memref<128x512xbf16, #tpu.memory_space<vmem>>, vector<128x512xbf16>
    %cst_11 = arith.constant dense<0.000000e+00> : vector<32x512xf32>
    %26 = tpu.matmul %24, %25, %cst_11 {dimension_numbers = #tpu.dot_dimension_numbers<[1], [0], [0], [1], [0, 0, 1, 1], [], []>} : vector<32x128xbf16>, vector<128x512xbf16>, vector<32x512xf32> -> vector<32x512xf32>
    %c0_12 = arith.constant 0 : index
    %c0_13 = arith.constant 0 : index
    %27 = vector.load %arg5[%c0_12, %c0_13] : memref<1x512xf32, #tpu.memory_space<vmem>>, vector<1x512xf32>
    %28 = vector.broadcast %27 : vector<1x512xf32> to vector<32x512xf32>
    %29 = arith.addf %26, %28 : vector<32x512xf32>
    %30 = arith.mulf %29, %29 : vector<32x512xf32>
    %31 = arith.mulf %29, %30 : vector<32x512xf32>
    %cst_14 = arith.constant 4.471500e-02 : f32
    %32 = vector.broadcast %cst_14 : f32 to vector<32x512xf32>
    %33 = arith.mulf %32, %31 : vector<32x512xf32>
    %34 = arith.addf %29, %33 : vector<32x512xf32>
    %cst_15 = arith.constant 0.797884583 : f32
    %35 = vector.broadcast %cst_15 : f32 to vector<32x512xf32>
    %36 = arith.mulf %35, %34 : vector<32x512xf32>
    %37 = math.tanh %36 : vector<32x512xf32>
    %cst_16 = arith.constant 1.000000e+00 : f32
    %38 = vector.broadcast %cst_16 : f32 to vector<32x512xf32>
    %39 = arith.addf %38, %37 : vector<32x512xf32>
    %cst_17 = arith.constant 5.000000e-01 : f32
    %40 = vector.broadcast %cst_17 : f32 to vector<32x512xf32>
    %41 = arith.mulf %40, %39 : vector<32x512xf32>
    %42 = arith.mulf %29, %41 : vector<32x512xf32>
    %43 = arith.truncf %42 : vector<32x512xf32> to vector<32x512xbf16>
    %c0_18 = arith.constant 0 : index
    %c0_19 = arith.constant 0 : index
    %44 = vector.load %arg6[%c0_18, %c0_19] : memref<512x128xbf16, #tpu.memory_space<vmem>>, vector<512x128xbf16>
    %cst_20 = arith.constant dense<0.000000e+00> : vector<32x128xf32>
    %45 = tpu.matmul %43, %44, %cst_20 {dimension_numbers = #tpu.dot_dimension_numbers<[1], [0], [0], [1], [0, 0, 1, 1], [], []>} : vector<32x512xbf16>, vector<512x128xbf16>, vector<32x128xf32> -> vector<32x128xf32>
    %c0_21 = arith.constant 0 : index
    %c0_22 = arith.constant 0 : index
    %46 = vector.load %arg7[%c0_21, %c0_22] : memref<1x128xf32, #tpu.memory_space<vmem>>, vector<1x128xf32>
    %47 = vector.broadcast %46 : vector<1x128xf32> to vector<32x128xf32>
    %48 = arith.addf %45, %47 : vector<32x128xf32>
    %49 = arith.addf %48, %1 : vector<32x128xf32>
    %50 = arith.truncf %49 : vector<32x128xf32> to vector<32x128xbf16>
    %c0_23 = arith.constant 0 : index
    %c0_24 = arith.constant 0 : index
    %51 = vector.load %arg8[%c0_23, %c0_24] : memref<32x128xbf16, #tpu.memory_space<vmem>>, vector<32x128xbf16>
    tpu.vector_store %arg8[%c0_23, %c0_24], %50 {strides = array<i32>} : memref<32x128xbf16, #tpu.memory_space<vmem>>, vector<32x128xbf16>,
    return
  }
  func.func @transform_0(%arg0: i32) -> (i32, i32) {
    %c0_i32 = arith.constant 0 : i32
    %c0_i32_0 = arith.constant 0 : i32
    return %arg0, %c0_i32 : i32, i32
  }
  func.func @transform_1(%arg0: i32) -> (i32, i32) {
    %c0_i32 = arith.constant 0 : i32
    %c0_i32_0 = arith.constant 0 : i32
    %c0_i32_1 = arith.constant 0 : i32
    return %c0_i32, %c0_i32_0 : i32, i32
  }
  func.func @transform_2(%arg0: i32) -> (i32, i32) {
    %c0_i32 = arith.constant 0 : i32
    %c0_i32_0 = arith.constant 0 : i32
    %c0_i32_1 = arith.constant 0 : i32
    return %c0_i32, %c0_i32_0 : i32, i32
  }
  func.func @transform_3(%arg0: i32) -> (i32, i32) {
    %c0_i32 = arith.constant 0 : i32
    %c0_i32_0 = arith.constant 0 : i32
    %c0_i32_1 = arith.constant 0 : i32
    return %c0_i32, %c0_i32_0 : i32, i32
  }
  func.func @transform_4(%arg0: i32) -> (i32, i32) {
    %c0_i32 = arith.constant 0 : i32
    %c0_i32_0 = arith.constant 0 : i32
    %c0_i32_1 = arith.constant 0 : i32
    return %c0_i32, %c0_i32_0 : i32, i32
  }
  func.func @transform_5(%arg0: i32) -> (i32, i32) {
    %c0_i32 = arith.constant 0 : i32
    %c0_i32_0 = arith.constant 0 : i32
    %c0_i32_1 = arith.constant 0 : i32
    return %c0_i32, %c0_i32_0 : i32, i32
  }
  func.func @transform_6(%arg0: i32) -> (i32, i32) {
    %c0_i32 = arith.constant 0 : i32
    %c0_i32_0 = arith.constant 0 : i32
    %c0_i32_1 = arith.constant 0 : i32
    return %c0_i32, %c0_i32_0 : i32, i32
  }
  func.func @transform_7(%arg0: i32) -> (i32, i32) {
    %c0_i32 = arith.constant 0 : i32
    %c0_i32_0 = arith.constant 0 : i32
    return %arg0, %c0_i32 : i32, i32
  }
}

module attributes {stable_mosaic.version = 11 : i64} {
  func.func @_attn_block_kernel(%arg0: i32, %arg1: i32, %arg2: i32, %arg3: memref<1x16x128xbf16, #tpu.memory_space<vmem>>, %arg4: memref<1x16x128xbf16, #tpu.memory_space<vmem>>, %arg5: memref<1x128xf32, #tpu.memory_space<vmem>>, %arg6: memref<1x128xf32, #tpu.memory_space<vmem>>, %arg7: memref<1x128x128xbf16, #tpu.memory_space<vmem>>, %arg8: memref<1x1x128xf32, #tpu.memory_space<vmem>>, %arg9: memref<1x128x256xbf16, #tpu.memory_space<vmem>>, %arg10: memref<1x1x256xf32, #tpu.memory_space<vmem>>, %arg11: memref<1x128x128xbf16, #tpu.memory_space<vmem>>, %arg12: memref<1x128xf32, #tpu.memory_space<vmem>>, %arg13: memref<1x16x128xbf16, #tpu.memory_space<vmem>>, %arg14: memref<16x128xf32, #tpu.memory_space<vmem>>) attributes {dimension_semantics = [#tpu.dimension_semantics<parallel>, #tpu.dimension_semantics<parallel>, #tpu.dimension_semantics<arbitrary>], iteration_bounds = array<i64: 2, 1, 4>, scalar_prefetch = 0 : i64, scratch_operands = 1 : i64, tpu.core_type = #tpu.core_type<tc>, window_params = [{transform_indices = @transform_0, window_bounds = array<i64: 1, 16, 128>}, {transform_indices = @transform_1, window_bounds = array<i64: 1, 16, 128>}, {pipeline_mode = #tpu.pipeline_mode<synchronous>, transform_indices = @transform_2, window_bounds = array<i64: 1, 128>}, {pipeline_mode = #tpu.pipeline_mode<synchronous>, transform_indices = @transform_3, window_bounds = array<i64: 1, 128>}, {transform_indices = @transform_4, window_bounds = array<i64: 1, 128, 128>}, {transform_indices = @transform_5, window_bounds = array<i64: 1, 1, 128>}, {transform_indices = @transform_6, window_bounds = array<i64: 1, 128, 256>}, {transform_indices = @transform_7, window_bounds = array<i64: 1, 1, 256>}, {transform_indices = @transform_8, window_bounds = array<i64: 1, 128, 128>}, {pipeline_mode = #tpu.pipeline_mode<synchronous>, transform_indices = @transform_9, window_bounds = array<i64: 1, 128>}, {transform_indices = @transform_10, window_bounds = array<i64: 1, 16, 128>}]} {
    %c0 = arith.constant 0 : index
    %c0_0 = arith.constant 0 : index
    %0 = vector.load %arg5[%c0, %c0_0] : memref<1x128xf32, #tpu.memory_space<vmem>>, vector<1x128xf32>
    %c0_1 = arith.constant 0 : index
    %c0_2 = arith.constant 0 : index
    %1 = vector.load %arg6[%c0_1, %c0_2] : memref<1x128xf32, #tpu.memory_space<vmem>>, vector<1x128xf32>
    %c0_3 = arith.constant 0 : index
    %c0_4 = arith.constant 0 : index
    %c0_5 = arith.constant 0 : index
    %2 = vector.load %arg3[%c0_3, %c0_4, %c0_5] : memref<1x16x128xbf16, #tpu.memory_space<vmem>>, vector<1x16x128xbf16>
    %3 = vector.shape_cast %2 : vector<1x16x128xbf16> to vector<16x128xbf16>
    %4 = arith.extf %3 : vector<16x128xbf16> to vector<16x128xf32>
    %cst = arith.constant dense<0.000000e+00> : vector<16xf32>
    %5 = vector.multi_reduction <add>, %4, %cst [1] : vector<16x128xf32> to vector<16xf32>
    %6 = vector.shape_cast %5 : vector<16xf32> to vector<16x1xf32>
    %cst_6 = arith.constant 1.280000e+02 : f32
    %7 = vector.broadcast %cst_6 : f32 to vector<16x1xf32>
    %8 = arith.divf %6, %7 : vector<16x1xf32>
    %9 = vector.broadcast %8 : vector<16x1xf32> to vector<16x128xf32>
    %10 = arith.subf %4, %9 : vector<16x128xf32>
    %11 = arith.mulf %10, %10 : vector<16x128xf32>
    %cst_7 = arith.constant dense<0.000000e+00> : vector<16xf32>
    %12 = vector.multi_reduction <add>, %11, %cst_7 [1] : vector<16x128xf32> to vector<16xf32>
    %13 = vector.shape_cast %12 : vector<16xf32> to vector<16x1xf32>
    %cst_8 = arith.constant 1.280000e+02 : f32
    %14 = vector.broadcast %cst_8 : f32 to vector<16x1xf32>
    %15 = arith.divf %13, %14 : vector<16x1xf32>
    %cst_9 = arith.constant 9.99999974E-6 : f32
    %16 = vector.broadcast %cst_9 : f32 to vector<16x1xf32>
    %17 = arith.addf %15, %16 : vector<16x1xf32>
    %18 = math.rsqrt %17 : vector<16x1xf32>
    %19 = vector.broadcast %18 : vector<16x1xf32> to vector<16x128xf32>
    %20 = arith.mulf %10, %19 : vector<16x128xf32>
    %21 = vector.broadcast %0 : vector<1x128xf32> to vector<16x128xf32>
    %22 = arith.mulf %20, %21 : vector<16x128xf32>
    %23 = vector.broadcast %1 : vector<1x128xf32> to vector<16x128xf32>
    %24 = arith.addf %22, %23 : vector<16x128xf32>
    %25 = arith.truncf %24 : vector<16x128xf32> to vector<16x128xbf16>
    %c0_10 = arith.constant 0 : index
    %c0_11 = arith.constant 0 : index
    %c0_12 = arith.constant 0 : index
    %26 = vector.load %arg4[%c0_10, %c0_11, %c0_12] : memref<1x16x128xbf16, #tpu.memory_space<vmem>>, vector<1x16x128xbf16>
    %27 = vector.shape_cast %26 : vector<1x16x128xbf16> to vector<16x128xbf16>
    %28 = arith.extf %27 : vector<16x128xbf16> to vector<16x128xf32>
    %cst_13 = arith.constant dense<0.000000e+00> : vector<16xf32>
    %29 = vector.multi_reduction <add>, %28, %cst_13 [1] : vector<16x128xf32> to vector<16xf32>
    %30 = vector.shape_cast %29 : vector<16xf32> to vector<16x1xf32>
    %cst_14 = arith.constant 1.280000e+02 : f32
    %31 = vector.broadcast %cst_14 : f32 to vector<16x1xf32>
    %32 = arith.divf %30, %31 : vector<16x1xf32>
    %33 = vector.broadcast %32 : vector<16x1xf32> to vector<16x128xf32>
    %34 = arith.subf %28, %33 : vector<16x128xf32>
    %35 = arith.mulf %34, %34 : vector<16x128xf32>
    %cst_15 = arith.constant dense<0.000000e+00> : vector<16xf32>
    %36 = vector.multi_reduction <add>, %35, %cst_15 [1] : vector<16x128xf32> to vector<16xf32>
    %37 = vector.shape_cast %36 : vector<16xf32> to vector<16x1xf32>
    %cst_16 = arith.constant 1.280000e+02 : f32
    %38 = vector.broadcast %cst_16 : f32 to vector<16x1xf32>
    %39 = arith.divf %37, %38 : vector<16x1xf32>
    %cst_17 = arith.constant 9.99999974E-6 : f32
    %40 = vector.broadcast %cst_17 : f32 to vector<16x1xf32>
    %41 = arith.addf %39, %40 : vector<16x1xf32>
    %42 = math.rsqrt %41 : vector<16x1xf32>
    %43 = vector.broadcast %42 : vector<16x1xf32> to vector<16x128xf32>
    %44 = arith.mulf %34, %43 : vector<16x128xf32>
    %45 = vector.broadcast %0 : vector<1x128xf32> to vector<16x128xf32>
    %46 = arith.mulf %44, %45 : vector<16x128xf32>
    %47 = vector.broadcast %1 : vector<1x128xf32> to vector<16x128xf32>
    %48 = arith.addf %46, %47 : vector<16x128xf32>
    %49 = arith.truncf %48 : vector<16x128xf32> to vector<16x128xbf16>
    %c0_18 = arith.constant 0 : index
    %c0_19 = arith.constant 0 : index
    %c0_20 = arith.constant 0 : index
    %50 = vector.load %arg7[%c0_18, %c0_19, %c0_20] : memref<1x128x128xbf16, #tpu.memory_space<vmem>>, vector<1x128x128xbf16>
    %51 = vector.shape_cast %50 : vector<1x128x128xbf16> to vector<128x128xbf16>
    %cst_21 = arith.constant dense<0.000000e+00> : vector<16x128xf32>
    %52 = tpu.matmul %25, %51, %cst_21 {dimension_numbers = #tpu.dot_dimension_numbers<[1], [0], [0], [1], [0, 0, 1, 1], [], []>} : vector<16x128xbf16>, vector<128x128xbf16>, vector<16x128xf32> -> vector<16x128xf32>
    %c0_22 = arith.constant 0 : index
    %c0_23 = arith.constant 0 : index
    %c0_24 = arith.constant 0 : index
    %53 = vector.load %arg8[%c0_22, %c0_23, %c0_24] : memref<1x1x128xf32, #tpu.memory_space<vmem>>, vector<1x1x128xf32>
    %54 = vector.shape_cast %53 : vector<1x1x128xf32> to vector<1x128xf32>
    %55 = vector.broadcast %54 : vector<1x128xf32> to vector<16x128xf32>
    %56 = arith.addf %52, %55 : vector<16x128xf32>
    %57 = arith.truncf %56 : vector<16x128xf32> to vector<16x128xbf16>
    %c0_25 = arith.constant 0 : index
    %c0_26 = arith.constant 0 : index
    %c0_27 = arith.constant 0 : index
    %58 = vector.load %arg9[%c0_25, %c0_26, %c0_27] : memref<1x128x256xbf16, #tpu.memory_space<vmem>>, vector<1x128x256xbf16>
    %59 = vector.shape_cast %58 : vector<1x128x256xbf16> to vector<128x256xbf16>
    %cst_28 = arith.constant dense<0.000000e+00> : vector<16x256xf32>
    %60 = tpu.matmul %49, %59, %cst_28 {dimension_numbers = #tpu.dot_dimension_numbers<[1], [0], [0], [1], [0, 0, 1, 1], [], []>} : vector<16x128xbf16>, vector<128x256xbf16>, vector<16x256xf32> -> vector<16x256xf32>
    %c0_29 = arith.constant 0 : index
    %c0_30 = arith.constant 0 : index
    %c0_31 = arith.constant 0 : index
    %61 = vector.load %arg10[%c0_29, %c0_30, %c0_31] : memref<1x1x256xf32, #tpu.memory_space<vmem>>, vector<1x1x256xf32>
    %62 = vector.shape_cast %61 : vector<1x1x256xf32> to vector<1x256xf32>
    %63 = vector.broadcast %62 : vector<1x256xf32> to vector<16x256xf32>
    %64 = arith.addf %60, %63 : vector<16x256xf32>
    %65 = vector.extract_strided_slice %64 {offsets = [0, 0], sizes = [16, 128], strides = [1, 1]} : vector<16x256xf32> to vector<16x128xf32>
    %66 = arith.truncf %65 : vector<16x128xf32> to vector<16x128xbf16>
    %67 = vector.extract_strided_slice %64 {offsets = [0, 128], sizes = [16, 128], strides = [1, 1]} : vector<16x256xf32> to vector<16x128xf32>
    %68 = arith.truncf %67 : vector<16x128xf32> to vector<16x128xbf16>
    %cst_32 = arith.constant dense<0.000000e+00> : vector<16x16xf32>
    %69 = tpu.matmul %57, %66, %cst_32 {dimension_numbers = #tpu.dot_dimension_numbers<[1], [1], [0], [0], [0, 0, 1, 0], [], []>} : vector<16x128xbf16>, vector<16x128xbf16>, vector<16x16xf32> -> vector<16x16xf32>
    %cst_33 = arith.constant dense<0xFF800000> : vector<16xf32>
    %70 = vector.multi_reduction <maximumf>, %69, %cst_33 [1] : vector<16x16xf32> to vector<16xf32>
    %71 = vector.shape_cast %70 : vector<16xf32> to vector<16x1xf32>
    %72 = vector.broadcast %71 : vector<16x1xf32> to vector<16x16xf32>
    %73 = arith.subf %69, %72 : vector<16x16xf32>
    %74 = math.exp %73 : vector<16x16xf32>
    %cst_34 = arith.constant dense<0.000000e+00> : vector<16xf32>
    %75 = vector.multi_reduction <add>, %74, %cst_34 [1] : vector<16x16xf32> to vector<16xf32>
    %76 = vector.shape_cast %75 : vector<16xf32> to vector<16x1xf32>
    %77 = tpu.reciprocal %76 {approx = true} : vector<16x1xf32> -> vector<16x1xf32>
    %78 = vector.broadcast %77 : vector<16x1xf32> to vector<16x16xf32>
    %79 = arith.mulf %74, %78 : vector<16x16xf32>
    %80 = arith.truncf %79 : vector<16x16xf32> to vector<16x16xbf16>
    %cst_35 = arith.constant dense<0.000000e+00> : vector<16x128xf32>
    %81 = tpu.matmul %80, %68, %cst_35 {dimension_numbers = #tpu.dot_dimension_numbers<[1], [0], [0], [1], [0, 0, 1, 1], [], []>} : vector<16x16xbf16>, vector<16x128xbf16>, vector<16x128xf32> -> vector<16x128xf32>
    %82 = arith.truncf %81 : vector<16x128xf32> to vector<16x128xbf16>
    %c0_36 = arith.constant 0 : index
    %c0_37 = arith.constant 0 : index
    %c0_38 = arith.constant 0 : index
    %83 = vector.load %arg11[%c0_36, %c0_37, %c0_38] : memref<1x128x128xbf16, #tpu.memory_space<vmem>>, vector<1x128x128xbf16>
    %84 = vector.shape_cast %83 : vector<1x128x128xbf16> to vector<128x128xbf16>
    %cst_39 = arith.constant dense<0.000000e+00> : vector<16x128xf32>
    %85 = tpu.matmul %82, %84, %cst_39 {dimension_numbers = #tpu.dot_dimension_numbers<[1], [0], [0], [1], [0, 0, 1, 1], [], []>} : vector<16x128xbf16>, vector<128x128xbf16>, vector<16x128xf32> -> vector<16x128xf32>
    %c0_i32 = arith.constant 0 : i32
    %86 = arith.cmpi eq, %arg2, %c0_i32 : i32
    %87 = arith.extui %86 : i1 to i32
    %c0_i32_40 = arith.constant 0 : i32
    %88 = arith.cmpi ne, %87, %c0_i32_40 : i32
    scf.if %88 {
      %c0_46 = arith.constant 0 : index
      %c0_47 = arith.constant 0 : index
      %95 = vector.load %arg12[%c0_46, %c0_47] : memref<1x128xf32, #tpu.memory_space<vmem>>, vector<1x128xf32>
      %96 = vector.broadcast %95 : vector<1x128xf32> to vector<16x128xf32>
      %97 = arith.addf %4, %96 : vector<16x128xf32>
      %c0_48 = arith.constant 0 : index
      %c0_49 = arith.constant 0 : index
      %98 = vector.load %arg14[%c0_48, %c0_49] : memref<16x128xf32, #tpu.memory_space<vmem>>, vector<16x128xf32>
      tpu.vector_store %arg14[%c0_48, %c0_49], %97 {strides = array<i32>} : memref<16x128xf32, #tpu.memory_space<vmem>>, vector<16x128xf32>,
    } else {
    }
    %c0_41 = arith.constant 0 : index
    %c0_42 = arith.constant 0 : index
    %89 = vector.load %arg14[%c0_41, %c0_42] : memref<16x128xf32, #tpu.memory_space<vmem>>, vector<16x128xf32>
    %90 = arith.addf %89, %85 : vector<16x128xf32>
    %c0_43 = arith.constant 0 : index
    %c0_44 = arith.constant 0 : index
    %91 = vector.load %arg14[%c0_43, %c0_44] : memref<16x128xf32, #tpu.memory_space<vmem>>, vector<16x128xf32>
    tpu.vector_store %arg14[%c0_43, %c0_44], %90 {strides = array<i32>} : memref<16x128xf32, #tpu.memory_space<vmem>>, vector<16x128xf32>,
    %c3_i32 = arith.constant 3 : i32
    %92 = arith.cmpi eq, %arg2, %c3_i32 : i32
    %93 = arith.extui %92 : i1 to i32
    %c0_i32_45 = arith.constant 0 : i32
    %94 = arith.cmpi ne, %93, %c0_i32_45 : i32
    scf.if %94 {
      %c0_46 = arith.constant 0 : index
      %c0_47 = arith.constant 0 : index
      %95 = vector.load %arg14[%c0_46, %c0_47] : memref<16x128xf32, #tpu.memory_space<vmem>>, vector<16x128xf32>
      %96 = arith.truncf %95 : vector<16x128xf32> to vector<16x128xbf16>
      %c0_48 = arith.constant 0 : index
      %c0_49 = arith.constant 0 : index
      %c0_50 = arith.constant 0 : index
      %97 = vector.load %arg13[%c0_48, %c0_49, %c0_50] : memref<1x16x128xbf16, #tpu.memory_space<vmem>>, vector<1x16x128xbf16>
      %98 = vector.shape_cast %97 : vector<1x16x128xbf16> to vector<16x128xbf16>
      %99 = vector.shape_cast %96 : vector<16x128xbf16> to vector<1x16x128xbf16>
      tpu.vector_store %arg13[%c0_48, %c0_49, %c0_50], %99 {strides = array<i32>} : memref<1x16x128xbf16, #tpu.memory_space<vmem>>, vector<1x16x128xbf16>,
    } else {
    }
    return
  }
  func.func @transform_0(%arg0: i32, %arg1: i32, %arg2: i32) -> (i32, i32, i32) {
    %c0_i32 = arith.constant 0 : i32
    %c0_i32_0 = arith.constant 0 : i32
    return %arg0, %arg1, %c0_i32 : i32, i32, i32
  }
  func.func @transform_1(%arg0: i32, %arg1: i32, %arg2: i32) -> (i32, i32, i32) {
    %c0_i32 = arith.constant 0 : i32
    %c0_i32_0 = arith.constant 0 : i32
    %c0_i32_1 = arith.constant 0 : i32
    return %arg0, %c0_i32, %c0_i32_0 : i32, i32, i32
  }
  func.func @transform_2(%arg0: i32, %arg1: i32, %arg2: i32) -> (i32, i32) {
    %c0_i32 = arith.constant 0 : i32
    %c0_i32_0 = arith.constant 0 : i32
    %c0_i32_1 = arith.constant 0 : i32
    return %c0_i32, %c0_i32_0 : i32, i32
  }
  func.func @transform_3(%arg0: i32, %arg1: i32, %arg2: i32) -> (i32, i32) {
    %c0_i32 = arith.constant 0 : i32
    %c0_i32_0 = arith.constant 0 : i32
    %c0_i32_1 = arith.constant 0 : i32
    return %c0_i32, %c0_i32_0 : i32, i32
  }
  func.func @transform_4(%arg0: i32, %arg1: i32, %arg2: i32) -> (i32, i32, i32) {
    %c0_i32 = arith.constant 0 : i32
    %c0_i32_0 = arith.constant 0 : i32
    %c0_i32_1 = arith.constant 0 : i32
    return %arg2, %c0_i32, %c0_i32_0 : i32, i32, i32
  }
  func.func @transform_5(%arg0: i32, %arg1: i32, %arg2: i32) -> (i32, i32, i32) {
    %c0_i32 = arith.constant 0 : i32
    %c0_i32_0 = arith.constant 0 : i32
    %c0_i32_1 = arith.constant 0 : i32
    return %arg2, %c0_i32, %c0_i32_0 : i32, i32, i32
  }
  func.func @transform_6(%arg0: i32, %arg1: i32, %arg2: i32) -> (i32, i32, i32) {
    %c0_i32 = arith.constant 0 : i32
    %c0_i32_0 = arith.constant 0 : i32
    %c0_i32_1 = arith.constant 0 : i32
    return %arg2, %c0_i32, %c0_i32_0 : i32, i32, i32
  }
  func.func @transform_7(%arg0: i32, %arg1: i32, %arg2: i32) -> (i32, i32, i32) {
    %c0_i32 = arith.constant 0 : i32
    %c0_i32_0 = arith.constant 0 : i32
    %c0_i32_1 = arith.constant 0 : i32
    return %arg2, %c0_i32, %c0_i32_0 : i32, i32, i32
  }
  func.func @transform_8(%arg0: i32, %arg1: i32, %arg2: i32) -> (i32, i32, i32) {
    %c0_i32 = arith.constant 0 : i32
    %c0_i32_0 = arith.constant 0 : i32
    %c0_i32_1 = arith.constant 0 : i32
    return %arg2, %c0_i32, %c0_i32_0 : i32, i32, i32
  }
  func.func @transform_9(%arg0: i32, %arg1: i32, %arg2: i32) -> (i32, i32) {
    %c0_i32 = arith.constant 0 : i32
    %c0_i32_0 = arith.constant 0 : i32
    %c0_i32_1 = arith.constant 0 : i32
    return %c0_i32, %c0_i32_0 : i32, i32
  }
  func.func @transform_10(%arg0: i32, %arg1: i32, %arg2: i32) -> (i32, i32, i32) {
    %c0_i32 = arith.constant 0 : i32
    %c0_i32_0 = arith.constant 0 : i32
    return %arg0, %arg1, %c0_i32 : i32, i32, i32
  }
}

</mosaic_0001>

<bundles_post_ra>
// kernel: shape_vae_forward.5
= control target key start
LH: loop header
LB: loop body
LE: loop exit
PB: predicated region body
PF: predicated region fallthrough
CT: control target
= control target key end

     0   :  { %v1237_v48 = vmov 0   ;;  %s1670_s0 = inlined_call_operand.vmem [shape: bf16[32,128], index: 0, kind: input, shape index: {}]   ;;  %s1671_s3 = inlined_call_operand.vmem [shape: bf16[128,512], index: 3, kind: input, shape index: {}]   ;;  %s1672_s1 = inlined_call_operand.vmem [shape: f32[1,128], index: 1, kind: input, shape index: {}]   ;;  %s1673_s2 = inlined_call_operand.vmem [shape: f32[1,128], index: 2, kind: input, shape index: {}]   ;;  %s1674_s5 = inlined_call_operand.vmem [shape: bf16[512,128], index: 5, kind: input, shape index: {}]   ;;  %s1675_s4 = inlined_call_operand.vmem [shape: f32[1,512], index: 4, kind: input, shape index: {}]   ;;  %s1676_s6 = inlined_call_operand.vmem [shape: f32[1,128], index: 6, kind: input, shape index: {}]   ;;  %s1677_s7 = inlined_call_operand.vmem [shape: bf16[32,128], index: 7, kind: output, shape index: {}]  }
   0x1   :  { %v1041_v0 = vld [vmem:[%s1670_s0] sm:$0xff]   ;;  %v1058_v1 = vld [vmem:[%s1670_s0 + $0x8] sm:$0xff]   ;;  %350 = vmatprep.mubr.bf16.mxu0 %v1237_v48  ;;  %403 = vmatprep.mubr.bf16.mxu1 %v1237_v48 }
   0x2   :  { %v1284_v2 = vunpack.c.l.bf16 %v1041_v0  ;;  %v1286_v3 = vunpack.c.l.bf16 %v1058_v1  ;;  %v1290_v4 = vunpack.c.h.bf16 %v1041_v0  ;;  %v1292_v5 = vunpack.c.h.bf16 %v1058_v1  ;;  %v1117_v6 = vld [vmem:[%s1671_s3 + $0xe4] ss:$16 sps:$4 sm:$0xff]   ;;  %v1119_v7 = vld [vmem:[%s1671_s3 + $0xec] ss:$16 sps:$4 sm:$0xff]   ;;  %v1121_v8 = vld [vmem:[%s1671_s3 + $0xe0] ss:$16 sps:$4 sm:$0xff]  }
   0x3   :  { %318 = vmatprep.subr.bf16.mxu0 %v1117_v6  ;;  %v1122_v9 = vld [vmem:[%s1671_s3 + $0xe8] ss:$16 sps:$4 sm:$0xff]   ;;  %371 = vmatprep.subr.bf16.mxu1 %v1119_v7  ;;  %v1123_v26 = vld [vmem:[%s1671_s3 + $0xc4] ss:$16 sps:$4 sm:$0xff]   ;;  %v1125_v27 = vld [vmem:[%s1671_s3 + $0xcc] ss:$16 sps:$4 sm:$0xff]  }
   0x4   :  { %37 = vadd.xlane.f32.xlu0 %v1284_v2  ;;  %41 = vadd.xlane.f32.xlu1 %v1286_v3  ;;  %v1127_v28 = vld [vmem:[%s1671_s3 + $0xc0] ss:$16 sps:$4 sm:$0xff]   ;;  %v1128_v29 = vld [vmem:[%s1671_s3 + $0xc8] ss:$16 sps:$4 sm:$0xff]   ;;  %v1129_v30 = vld [vmem:[%s1671_s3 + $0xa4] ss:$16 sps:$4 sm:$0xff]  }
   0x5   :  { %319 = vmatpush1.bf16.msra.mxu0 %v1121_v8  ;;  %372 = vmatpush1.bf16.msra.mxu1 %v1122_v9  ;;  %v1131_v31 = vld [vmem:[%s1671_s3 + $0xac] ss:$16 sps:$4 sm:$0xff]   ;;  %v1133_v32 = vld [vmem:[%s1671_s3 + $0xa0] ss:$16 sps:$4 sm:$0xff]   ;;  %v1134_v33 = vld [vmem:[%s1671_s3 + $0xa8] ss:$16 sps:$4 sm:$0xff]  }
   0x6   :  { %320 = vmatprep.subr.bf16.mxu0 %v1123_v26  ;;  %373 = vmatprep.subr.bf16.mxu1 %v1125_v27  ;;  %v1135_v34 = vld [vmem:[%s1671_s3 + $0x84] ss:$16 sps:$4 sm:$0xff]   ;;  %v1137_v35 = vld [vmem:[%s1671_s3 + $0x8c] ss:$16 sps:$4 sm:$0xff]   ;;  %v1139_v36 = vld [vmem:[%s1671_s3 + $0x80] ss:$16 sps:$4 sm:$0xff]  }
   0x7   :  { %v1140_v37 = vld [vmem:[%s1671_s3 + $0x88] ss:$16 sps:$4 sm:$0xff]   ;;  %v1141_v38 = vld [vmem:[%s1671_s3 + $0x64] ss:$16 sps:$4 sm:$0xff]   ;;  %v1143_v39 = vld [vmem:[%s1671_s3 + $0x6c] ss:$16 sps:$4 sm:$0xff]  }
   0x8   :  { %39 = vadd.xlane.f32.xlu0 %v1290_v4  ;;  %43 = vadd.xlane.f32.xlu1 %v1292_v5  ;;  %v1145_v40 = vld [vmem:[%s1671_s3 + $0x60] ss:$16 sps:$4 sm:$0xff]   ;;  %v1146_v41 = vld [vmem:[%s1671_s3 + $0x68] ss:$16 sps:$4 sm:$0xff]   ;;  %v1147_v42 = vld [vmem:[%s1671_s3 + $0x44] ss:$16 sps:$4 sm:$0xff]  }
   0x9   :  { %321 = vmatpush1.bf16.msra.mxu0 %v1127_v28  ;;  %374 = vmatpush1.bf16.msra.mxu1 %v1128_v29  ;;  %v1149_v43 = vld [vmem:[%s1671_s3 + $0x4c] ss:$16 sps:$4 sm:$0xff]   ;;  %v1151_v44 = vld [vmem:[%s1671_s3 + $0x40] ss:$16 sps:$4 sm:$0xff]   ;;  %v1152_v45 = vld [vmem:[%s1671_s3 + $0x48] ss:$16 sps:$4 sm:$0xff]  }
   0xa   :  { %322 = vmatprep.subr.bf16.mxu0 %v1129_v30  ;;  %375 = vmatprep.subr.bf16.mxu1 %v1131_v31  ;;  %v1153_v46 = vld [vmem:[%s1671_s3 + $0x24] ss:$16 sps:$4 sm:$0xff]   ;;  %v1155_v47 = vld [vmem:[%s1671_s3 + $0x2c] ss:$16 sps:$4 sm:$0xff]   ;;  %v1157_v49 = vld [vmem:[%s1671_s3 + $0x20] ss:$16 sps:$4 sm:$0xff]  }
   0xb   :  { %v1158_v50 = vld [vmem:[%s1671_s3 + $0x28] ss:$16 sps:$4 sm:$0xff]   ;;  %v1159_v51 = vld [vmem:[%s1671_s3 + $0x4] ss:$16 sps:$4 sm:$0xff]   ;;  %v1161_v52 = vld [vmem:[%s1671_s3 + $0xc] ss:$16 sps:$4 sm:$0xff]  }
   0xc   :  { %v1163_v53 = vld [vmem:[%s1671_s3] ss:$16 sps:$4 sm:$0xff]   ;;  %v1164_v54 = vld [vmem:[%s1671_s3 + $0x8] ss:$16 sps:$4 sm:$0xff]  }
   0xd   :  { %323 = vmatpush1.bf16.msra.mxu0 %v1133_v32  ;;  %376 = vmatpush1.bf16.msra.mxu1 %v1134_v33  ;;  %v965_v9 = vld [vmem:[%s1672_s1] ss:$0 sm:$0xff]  ;;  %v1165_v29 = vld [vmem:[%s1674_s5 + $0x78] sm:$0xff]   ;;  %v1169_v31 = vld [vmem:[%s1674_s5 + $0x70] sm:$0xff]  }
   0xe   :  { %324 = vmatprep.subr.bf16.mxu0 %v1135_v34  ;;  %377 = vmatprep.subr.bf16.mxu1 %v1137_v35  ;;  %v1168_v30 = vld [vmem:[%s1674_s5 + $0xb8] sm:$0xff]   ;;  %v1170_v32 = vld [vmem:[%s1674_s5 + $0xf0] sm:$0xff]   ;;  %v1173_v35 = vld [vmem:[%s1674_s5 + $0x68] sm:$0xff]  }
   0xf   :  { %v1171_v33 = vld [vmem:[%s1674_s5 + $0x30] sm:$0xff]  }
  0x10   :  { %v1172_v34 = vld [vmem:[%s1674_s5 + $0xb0] sm:$0xff]  }
  0x11   :  { %325 = vmatpush1.bf16.msra.mxu0 %v1139_v36  ;;  %378 = vmatpush1.bf16.msra.mxu1 %v1140_v37  ;;  %v1174_v36 = vld [vmem:[%s1674_s5 + $0xe8] sm:$0xff]  }
  0x12   :  { %326 = vmatprep.subr.bf16.mxu0 %v1141_v38  ;;  %379 = vmatprep.subr.bf16.mxu1 %v1143_v39  ;;  %v1175_v37 = vld [vmem:[%s1674_s5 + $0x28] sm:$0xff]   ;;  %v1177_v39 = vld [vmem:[%s1674_s5 + $0x60] sm:$0xff]  }
  0x13   :  { %v1176_v38 = vld [vmem:[%s1674_s5 + $0xa8] sm:$0xff]  }
  0x15   :  { %327 = vmatpush1.bf16.msra.mxu0 %v1145_v40  ;;  %380 = vmatpush1.bf16.msra.mxu1 %v1146_v41  ;;  %v1178_v40 = vld [vmem:[%s1674_s5 + $0xe0] sm:$0xff]  }
  0x16   :  { %328 = vmatprep.subr.bf16.mxu0 %v1147_v42  ;;  %381 = vmatprep.subr.bf16.mxu1 %v1149_v43  ;;  %v1179_v41 = vld [vmem:[%s1674_s5 + $0x20] sm:$0xff]   ;;  %v1181_v43 = vld [vmem:[%s1674_s5 + $0x58] sm:$0xff]  }
  0x17   :  { %v1180_v42 = vld [vmem:[%s1674_s5 + $0xa0] sm:$0xff]  }
  0x19   :  { %329 = vmatpush1.bf16.msra.mxu0 %v1151_v44  ;;  %382 = vmatpush1.bf16.msra.mxu1 %v1152_v45  ;;  %v1182_v44 = vld [vmem:[%s1674_s5 + $0xd8] sm:$0xff]  }
  0x1a   :  { %330 = vmatprep.subr.bf16.mxu0 %v1153_v46  ;;  %383 = vmatprep.subr.bf16.mxu1 %v1155_v47  ;;  %v1183_v45 = vld [vmem:[%s1674_s5 + $0x18] sm:$0xff]   ;;  %v1185_v47 = vld [vmem:[%s1674_s5 + $0x50] sm:$0xff]  }
  0x1b   :  { %v1184_v46 = vld [vmem:[%s1674_s5 + $0x98] sm:$0xff]  }
  0x1d   :  { %331 = vmatpush1.bf16.msra.mxu0 %v1157_v49  ;;  %384 = vmatpush1.bf16.msra.mxu1 %v1158_v50  ;;  %v1187_v49 = vld [vmem:[%s1674_s5 + $0x10] sm:$0xff]  }
  0x1e   :  { %332 = vmatprep.subr.bf16.mxu0 %v1159_v51  ;;  %385 = vmatprep.subr.bf16.mxu1 %v1161_v52  ;;  %v1188_v50 = vld [vmem:[%s1674_s5 + $0x90] sm:$0xff]   ;;  %v1189_v51 = vld [vmem:[%s1674_s5 + $0x48] sm:$0xff]  }
  0x1f   :  { %v1190_v52 = vld [vmem:[%s1674_s5 + $0xc8] sm:$0xff]  }
  0x21   :  { %333 = vmatpush1.bf16.msra.mxu0 %v1163_v53  ;;  %386 = vmatpush1.bf16.msra.mxu1 %v1164_v54  ;;  %v1191_v53 = vld [vmem:[%s1674_s5 + $0x8] sm:$0xff]  }
  0x22   :  { %1060 = vmatprep.subr.bf16.mxu0 %v1165_v29  ;;  %v1192_v54 = vld [vmem:[%s1674_s5 + $0x88] sm:$0xff]  }
  0x8d   :  { %v38_v10 = vpop.xlane.xlu0 %37  ;;  %v42_v11 = vpop.xlane.xlu1 %41 }
  0x8e   :  { %v46_v12 = vmul.f32 0.0078125, %v38_v10  ;;  %v48_v13 = vmul.f32 0.0078125, %v42_v11 }
  0x90   :  { %v1309_v14 = vsub.f32 %v1284_v2, %v46_v12  ;;  %v1312_v15 = vsub.f32 %v1286_v3, %v48_v13 }
  0x91   :  { %v40_v16 = vpop.xlane.xlu0 %39  ;;  %v44_v17 = vpop.xlane.xlu1 %43 }
  0x92   :  { %v47_v18 = vmul.f32 0.0078125, %v40_v16  ;;  %v54_v19 = vmul.f32 %v1309_v14, %v1309_v14  ;;  %v49_v20 = vmul.f32 0.0078125, %v44_v17  ;;  %v56_v23 = vmul.f32 %v1312_v15, %v1312_v15  ;;  %v966_v16 = vld [vmem:[%s1673_s2] ss:$0 sm:$0xff] }
  0x94   :  { %v1317_v21 = vsub.f32 %v1290_v4, %v47_v18  ;;  %58 = vadd.xlane.f32.xlu0 %v54_v19  ;;  %v1320_v22 = vsub.f32 %v1292_v5, %v49_v20 }
  0x96   :  { %v55_v24 = vmul.f32 %v1317_v21, %v1317_v21  ;;  %v57_v25 = vmul.f32 %v1320_v22, %v1320_v22 }
  0x98   :  { %62 = vadd.xlane.f32.xlu0 %v56_v23  ;;  %60 = vadd.xlane.f32.xlu1 %v55_v24 }
  0x9c   :  { %64 = vadd.xlane.f32.xlu1 %v57_v25 }
 0x11d   :  { %v59_v55 = vpop.xlane.xlu0 %58 }
 0x11e   :  { %v66_v56 = vmul.f32 0.0078125, %v59_v55  ;;  %v1193_v55 = vld [vmem:[%s1674_s5 + $0x40] sm:$0xff]  }
 0x120   :  { %v70_v57 = vadd.f32 1e-05, %v66_v56  ;;  %v1194_v56 = vld [vmem:[%s1674_s5 + $0xc0] sm:$0xff]  }
 0x121   :  { %v61_v58 = vpop.xlane.xlu1 %60  ;;  %v63_v59 = vpop.xlane.xlu0 %62 }
 0x122   :  { %1197 = vrsqrt.f32 %v70_v57  ;;  %v67_v60 = vmul.f32 0.0078125, %v61_v58  ;;  %v68_v61 = vmul.f32 0.0078125, %v63_v59  ;;  %v1195_v57 = vld [vmem:[%s1674_s5] sm:$0xff]   ;;  %v138_v59 = vlaneseq }
 0x123   :  { %v1196_v58 = vld [vmem:[%s1674_s5 + $0x80] sm:$0xff]  }
 0x124   :  { %v71_v62 = vadd.f32 1e-05, %v67_v60  ;;  %v72_v63 = vadd.f32 1e-05, %v68_v61  ;;  %v139_v60 = vshrl.u32 %v138_v59, 7 }
 0x125   :  { %v65_v0 = vpop.xlane.xlu1 %64 }
 0x126   :  { %1199 = vrsqrt.f32 %v71_v62  ;;  %v69_v1 = vmul.f32 0.0078125, %v65_v0  ;;  %v140_v61 = vsub.s32 0, %v139_v60  ;;  %v148_v62 = vsub.s32 2, %v139_v60 }
 0x127   :  { %1201 = vrsqrt.f32 %v72_v63  ;;  %v136_v63 = vld [vmem:[%s1675_s4] sm:$0xf]  ;;  %v144_v0 = vsub.s32 1, %v139_v60 }
 0x128   :  { %v73_v6 = vadd.f32 1e-05, %v69_v1  ;;  %v152_v1 = vsub.s32 3, %v139_v60 }
 0x12a   :  { %1203 = vrsqrt.f32 %v73_v6  ;;  %v1521_v6 = vrot.slane %v136_v63, %v140_v61 }
 0x12f   :  { %v1198_v7 = vpop.eup %1197 }
 0x130   :  { %v78_v8 = vmul.f32 %v1198_v7, %v1309_v14  ;;  %v1523_v7 = vrot.slane %v136_v63, %v148_v62 }
 0x132   :  { %v88_v12 = vmul.f32 %v965_v9, %v78_v8  ;;  %v1525_v8 = vrot.slane %v136_v63, %v144_v0 }
 0x133   :  { %v1200_v10 = vpop.eup %1199 }
 0x134   :  { %v79_v11 = vmul.f32 %v1200_v10, %v1317_v21  ;;  %v1202_v13 = vpop.eup %1201  ;;  %v98_v19 = vadd.f32 %v966_v16, %v88_v12 }
 0x135   :  { %v80_v23 = vmul.f32 %v1202_v13, %v1312_v15  ;;  %v1166_v15 = vld [vmem:[%s1674_s5 + $0xf8] sm:$0xff]  }
 0x136   :  { %v89_v17 = vmul.f32 %v965_v9, %v79_v11  ;;  %1088 = vmatprep.subr.bf16.mxu1 %v1166_v15 }
 0x137   :  { %v1204_v18 = vpop.eup %1203  ;;  %v90_v26 = vmul.f32 %v965_v9, %v80_v23 }
 0x138   :  { %v99_v20 = vadd.f32 %v966_v16, %v89_v17  ;;  %v81_v14 = vmul.f32 %v1204_v18, %v1320_v22  ;;  %v1167_v22 = vld [vmem:[%s1674_s5 + $0x38] sm:$0xff]  }
 0x139   :  { %v100_v27 = vadd.f32 %v966_v16, %v90_v26 }
 0x13a   :  { %v102_v24 = vpack.c.bf16 %v99_v20, %v98_v19  ;;  %v91_v25 = vmul.f32 %v965_v9, %v81_v14  ;;  %v1527_v9 = vrot.slane %v136_v63, %v152_v1 }
 0x13c   :  { %351 = vmatmul.mubr.bf16.vlgmr.msra.gmra.mxu0 %v102_v24  ;;  %404 = vmatmul.mubr.bf16.vlgmr.msra.gmra.mxu1 %v102_v24  ;;  %v101_v21 = vadd.f32 %v966_v16, %v91_v25 }
 0x13d   :  { %360 = vmatprep.mubr.bf16.mxu0 %v1237_v48  ;;  %413 = vmatprep.mubr.bf16.mxu1 %v1237_v48  ;;  %v1186_v48 = vld [vmem:[%s1674_s5 + $0xd0] sm:$0xff]  }
 0x13e   :  { %v103_v28 = vpack.c.bf16 %v101_v21, %v100_v27  ;;  %1061 = vmatpush3.bf16.msra.mxu0 %v1167_v22  ;;  %1089 = vmatpush3.bf16.msra.mxu1 %v1168_v30 }
 0x13f   :  { %1062 = vmatprep.subr.bf16.mxu0 %v1169_v31  ;;  %1090 = vmatprep.subr.bf16.mxu1 %v1170_v32 }
 0x142   :  { %1063 = vmatpush3.bf16.msra.mxu0 %v1171_v33  ;;  %1091 = vmatpush3.bf16.msra.mxu1 %v1172_v34 }
 0x143   :  { %1064 = vmatprep.subr.bf16.mxu0 %v1173_v35  ;;  %1092 = vmatprep.subr.bf16.mxu1 %v1174_v36 }
 0x144   :  { %361 = vmatmul.mubr.bf16.gmra.mxu0 %v103_v28  ;;  %414 = vmatmul.mubr.bf16.gmra.mxu1 %v103_v28 }
 0x146   :  { %1065 = vmatpush3.bf16.msra.mxu0 %v1175_v37  ;;  %1093 = vmatpush3.bf16.msra.mxu1 %v1176_v38 }
 0x147   :  { %1066 = vmatprep.subr.bf16.mxu0 %v1177_v39  ;;  %1094 = vmatprep.subr.bf16.mxu1 %v1178_v40 }
 0x14a   :  { %1067 = vmatpush3.bf16.msra.mxu0 %v1179_v41  ;;  %1095 = vmatpush3.bf16.msra.mxu1 %v1180_v42 }
 0x14b   :  { %1068 = vmatprep.subr.bf16.mxu0 %v1181_v43  ;;  %1096 = vmatprep.subr.bf16.mxu1 %v1182_v44 }
 0x14e   :  { %1069 = vmatpush3.bf16.msra.mxu0 %v1183_v45  ;;  %1097 = vmatpush3.bf16.msra.mxu1 %v1184_v46 }
 0x14f   :  { %1070 = vmatprep.subr.bf16.mxu0 %v1185_v47  ;;  %1098 = vmatprep.subr.bf16.mxu1 %v1186_v48 }
 0x152   :  { %1071 = vmatpush3.bf16.msra.mxu0 %v1187_v49  ;;  %1099 = vmatpush3.bf16.msra.mxu1 %v1188_v50 }
 0x153   :  { %1072 = vmatprep.subr.bf16.mxu0 %v1189_v51  ;;  %1100 = vmatprep.subr.bf16.mxu1 %v1190_v52 }
 0x156   :  { %1073 = vmatpush3.bf16.msra.mxu0 %v1191_v53  ;;  %1101 = vmatpush3.bf16.msra.mxu1 %v1192_v54 }
 0x157   :  { %1074 = vmatprep.subr.bf16.mxu0 %v1193_v55  ;;  %1102 = vmatprep.subr.bf16.mxu1 %v1194_v56 }
 0x15a   :  { %1075 = vmatpush3.bf16.msra.mxu0 %v1195_v57  ;;  %1103 = vmatpush3.bf16.msra.mxu1 %v1196_v58 }
 0x1fc   :  { %v352_v10 = vpop.f32.mrf.mxu0  ;;  %v405_v11 = vpop.f32.mrf.mxu1 }
 0x1fd   :  { %v1530_v12 = vadd.f32 %v352_v10, %v1521_v6  ;;  %v1533_v13 = vadd.f32 %v405_v11, %v1523_v7 }
 0x1fe   :  { %v354_v16 = vpop.f32.mrf.mxu0  ;;  %v407_v17 = vpop.f32.mrf.mxu1 }
 0x1ff   :  { %v424_v18 = vmul.f32 %v1530_v12, %v1530_v12  ;;  %v426_v19 = vmul.f32 %v1533_v13, %v1533_v13  ;;  %v1540_v20 = vadd.f32 %v354_v16, %v1525_v8  ;;  %v1543_v23 = vadd.f32 %v407_v17, %v1527_v9 }
 0x200   :  { %v356_v14 = vpop.f32.mrf.mxu0  ;;  %v409_v24 = vpop.f32.mrf.mxu1 }
 0x201   :  { %v440_v25 = vmul.f32 %v424_v18, %v1530_v12  ;;  %v442_v26 = vmul.f32 %v426_v19, %v1533_v13  ;;  %v425_v21 = vmul.f32 %v1540_v20, %v1540_v20  ;;  %v427_v27 = vmul.f32 %v1543_v23, %v1543_v23 }
 0x202   :  { %v1552_v28 = vadd.f32 %v356_v14, %v1521_v6  ;;  %v1555_v29 = vadd.f32 %v409_v24, %v1523_v7  ;;  %v358_v15 = vpop.f32.mrf.mxu0  ;;  %v411_v22 = vpop.f32.mrf.mxu1 }
 0x203   :  { %v456_v30 = vmul.f32 0.044715, %v440_v25  ;;  %v458_v31 = vmul.f32 0.044715, %v442_v26  ;;  %v441_v32 = vmul.f32 %v425_v21, %v1540_v20  ;;  %v443_v33 = vmul.f32 %v427_v27, %v1543_v23 }
 0x204   :  { %v428_v34 = vmul.f32 %v1552_v28, %v1552_v28  ;;  %v430_v35 = vmul.f32 %v1555_v29, %v1555_v29  ;;  %v1564_v36 = vadd.f32 %v358_v15, %v1525_v8  ;;  %v1567_v37 = vadd.f32 %v411_v22, %v1527_v9  ;;  %v362_v38 = vpop.f32.mrf.mxu0  ;;  %v415_v39 = vpop.f32.mrf.mxu1 }
 0x205   :  { %v472_v40 = vadd.f32 %v456_v30, %v1530_v12  ;;  %v474_v41 = vadd.f32 %v458_v31, %v1533_v13  ;;  %v457_v42 = vmul.f32 0.044715, %v441_v32  ;;  %v459_v43 = vmul.f32 0.044715, %v443_v33 }
 0x206   :  { %v444_v44 = vmul.f32 %v428_v34, %v1552_v28  ;;  %v446_v45 = vmul.f32 %v430_v35, %v1555_v29  ;;  %v429_v46 = vmul.f32 %v1564_v36, %v1564_v36  ;;  %v431_v47 = vmul.f32 %v1567_v37, %v1567_v37  ;;  %v364_v52 = vpop.f32.mrf.mxu0  ;;  %v417_v57 = vpop.f32.mrf.mxu1 }
 0x207   :  { %v488_v48 = vmul.f32 0.7978846, %v472_v40  ;;  %v490_v49 = vmul.f32 0.7978846, %v474_v41  ;;  %v473_v50 = vadd.f32 %v457_v42, %v1540_v20  ;;  %v475_v51 = vadd.f32 %v459_v43, %v1543_v23 }
 0x208   :  { %v460_v53 = vmul.f32 0.044715, %v444_v44  ;;  %v462_v54 = vmul.f32 0.044715, %v446_v45  ;;  %v445_v55 = vmul.f32 %v429_v46, %v1564_v36  ;;  %v447_v56 = vmul.f32 %v431_v47, %v1567_v37  ;;  %v366_v11 = vpop.f32.mrf.mxu0  ;;  %v419_v19 = vpop.f32.mrf.mxu1 }
 0x209   :  { %1205 = vtanh.f32 %v488_v48  ;;  %v489_v58 = vmul.f32 0.7978846, %v473_v50  ;;  %v491_v59 = vmul.f32 0.7978846, %v475_v51  ;;  %v1582_v60 = vadd.f32 %v362_v38, %v1521_v6 }
 0x20a   :  { %1207 = vtanh.f32 %v490_v49  ;;  %v476_v61 = vadd.f32 %v460_v53, %v1552_v28  ;;  %v478_v62 = vadd.f32 %v462_v54, %v1555_v29  ;;  %v461_v63 = vmul.f32 0.044715, %v445_v55  ;;  %v368_v32 = vpop.f32.mrf.mxu0  ;;  %v421_v38 = vpop.f32.mrf.mxu1 }
 0x20b   :  { %1209 = vtanh.f32 %v489_v58  ;;  %v463_v0 = vmul.f32 0.044715, %v447_v56  ;;  %v432_v1 = vmul.f32 %v1582_v60, %v1582_v60  ;;  %v1589_v10 = vadd.f32 %v415_v39, %v1523_v7 }
 0x20c   :  { %1211 = vtanh.f32 %v491_v59  ;;  %v492_v16 = vmul.f32 0.7978846, %v476_v61  ;;  %v494_v17 = vmul.f32 0.7978846, %v478_v62  ;;  %v477_v18 = vadd.f32 %v461_v63, %v1564_v36 }
 0x20d   :  { %v479_v14 = vadd.f32 %v463_v0, %v1567_v37  ;;  %v448_v24 = vmul.f32 %v432_v1, %v1582_v60  ;;  %v434_v25 = vmul.f32 %v1589_v10, %v1589_v10  ;;  %v1597_v26 = vadd.f32 %v364_v52, %v1525_v8 }
 0x20e   :  { %1213 = vtanh.f32 %v492_v16  ;;  %v493_v21 = vmul.f32 0.7978846, %v477_v18  ;;  %v1600_v27 = vadd.f32 %v417_v57, %v1527_v9  ;;  %v1603_v15 = vadd.f32 %v366_v11, %v1521_v6 }
 0x20f   :  { %1215 = vtanh.f32 %v494_v17  ;;  %v495_v22 = vmul.f32 0.7978846, %v479_v14  ;;  %v464_v30 = vmul.f32 0.044715, %v448_v24  ;;  %v450_v31 = vmul.f32 %v434_v25, %v1589_v10 }
 0x210   :  { %1217 = vtanh.f32 %v493_v21  ;;  %v433_v33 = vmul.f32 %v1597_v26, %v1597_v26  ;;  %v435_v34 = vmul.f32 %v1600_v27, %v1600_v27  ;;  %v436_v35 = vmul.f32 %v1603_v15, %v1603_v15 }
 0x211   :  { %1219 = vtanh.f32 %v495_v22  ;;  %v480_v6 = vadd.f32 %v464_v30, %v1582_v60  ;;  %v466_v39 = vmul.f32 0.044715, %v450_v31  ;;  %v1614_v40 = vadd.f32 %v419_v19, %v1523_v7 }
 0x212   :  { %v449_v41 = vmul.f32 %v433_v33, %v1597_v26  ;;  %v451_v42 = vmul.f32 %v435_v34, %v1600_v27  ;;  %v452_v43 = vmul.f32 %v436_v35, %v1603_v15  ;;  %v1620_v44 = vadd.f32 %v368_v32, %v1525_v8 }
 0x213   :  { %v496_v45 = vmul.f32 0.7978846, %v480_v6  ;;  %v482_v46 = vadd.f32 %v466_v39, %v1589_v10  ;;  %v438_v47 = vmul.f32 %v1614_v40, %v1614_v40  ;;  %v1626_v48 = vadd.f32 %v421_v38, %v1527_v9 }
 0x214   :  { %v465_v7 = vmul.f32 0.044715, %v449_v41  ;;  %v467_v49 = vmul.f32 0.044715, %v451_v42  ;;  %v468_v50 = vmul.f32 0.044715, %v452_v43  ;;  %v437_v51 = vmul.f32 %v1620_v44, %v1620_v44 }
 0x215   :  { %v498_v52 = vmul.f32 0.7978846, %v482_v46  ;;  %v454_v53 = vmul.f32 %v438_v47, %v1614_v40  ;;  %v439_v8 = vmul.f32 %v1626_v48, %v1626_v48  ;;  %1221 = vtanh.f32 %v496_v45 }
 0x216   :  { %v1206_v54 = vpop.eup %1205  ;;  %v481_v55 = vadd.f32 %v465_v7, %v1597_v26  ;;  %v483_v56 = vadd.f32 %v467_v49, %v1600_v27  ;;  %v484_v9 = vadd.f32 %v468_v50, %v1603_v15  ;;  %v453_v57 = vmul.f32 %v437_v51, %v1620_v44 }
 0x217   :  { %v1208_v58 = vpop.eup %1207  ;;  %v470_v59 = vmul.f32 0.044715, %v454_v53  ;;  %v455_v61 = vmul.f32 %v439_v8, %v1626_v48  ;;  %1223 = vtanh.f32 %v498_v52  ;;  %v520_v24 = vadd.f32 1.0, %v1206_v54 }
 0x218   :  { %v1210_v62 = vpop.eup %1209  ;;  %v497_v63 = vmul.f32 0.7978846, %v481_v55  ;;  %v499_v0 = vmul.f32 0.7978846, %v483_v56  ;;  %v500_v11 = vmul.f32 0.7978846, %v484_v9 }
 0x219   :  { %v1212_v1 = vpop.eup %1211  ;;  %v486_v16 = vadd.f32 %v470_v59, %v1614_v40  ;;  %v469_v17 = vmul.f32 0.044715, %v453_v57  ;;  %v471_v18 = vmul.f32 0.044715, %v455_v61  ;;  %v521_v19 = vadd.f32 1.0, %v1210_v62 }
 0x21a   :  { %1225 = vtanh.f32 %v497_v63  ;;  %v522_v30 = vadd.f32 1.0, %v1208_v58  ;;  %v523_v43 = vadd.f32 1.0, %v1212_v1  ;;  %v536_v45 = vmul.f32 0.5, %v520_v24 }
 0x21b   :  { %v1214_v14 = vpop.eup %1213  ;;  %1227 = vtanh.f32 %v499_v0  ;;  %v502_v25 = vmul.f32 0.7978846, %v486_v16  ;;  %v485_v21 = vadd.f32 %v469_v17, %v1620_v44  ;;  %v487_v32 = vadd.f32 %v471_v18, %v1626_v48 }
 0x21c   :  { %v1216_v22 = vpop.eup %1215  ;;  %v524_v31 = vadd.f32 1.0, %v1214_v14  ;;  %1229 = vtanh.f32 %v500_v11  ;;  %v537_v38 = vmul.f32 0.5, %v521_v19  ;;  %v538_v7 = vmul.f32 0.5, %v522_v30 }
 0x21d   :  { %v1218_v33 = vpop.eup %1217  ;;  %v526_v34 = vadd.f32 1.0, %v1216_v22  ;;  %1231 = vtanh.f32 %v502_v25  ;;  %v501_v35 = vmul.f32 0.7978846, %v485_v21  ;;  %v503_v41 = vmul.f32 0.7978846, %v487_v32 }
 0x21e   :  { %v1220_v6 = vpop.eup %1219  ;;  %v540_v39 = vmul.f32 0.5, %v524_v31  ;;  %v525_v42 = vadd.f32 1.0, %v1218_v33  ;;  %v539_v50 = vmul.f32 0.5, %v523_v43  ;;  %v553_v8 = vmul.f32 %v537_v38, %v1540_v20 }
 0x21f   :  { %v542_v46 = vmul.f32 0.5, %v526_v34  ;;  %1233 = vtanh.f32 %v501_v35  ;;  %v527_v47 = vadd.f32 1.0, %v1220_v6  ;;  %v552_v55 = vmul.f32 %v536_v45, %v1530_v12 }
 0x220   :  { %1235 = vtanh.f32 %v503_v41  ;;  %v541_v49 = vmul.f32 0.5, %v525_v42  ;;  %v556_v51 = vmul.f32 %v540_v39, %v1552_v28  ;;  %v555_v56 = vmul.f32 %v539_v50, %v1543_v23 }
 0x221   :  { %v543_v52 = vmul.f32 0.5, %v527_v47  ;;  %v558_v53 = vmul.f32 %v542_v46, %v1555_v29  ;;  %v554_v57 = vmul.f32 %v538_v7, %v1533_v13 }
 0x222   :  { %v557_v54 = vmul.f32 %v541_v49, %v1564_v36  ;;  %v1222_v59 = vpop.eup %1221  ;;  %v568_v61 = vpack.c.bf16 %v556_v51, %v552_v55 }
 0x223   :  { %v559_v9 = vmul.f32 %v543_v52, %v1567_v37  ;;  %v570_v63 = vpack.c.bf16 %v558_v53, %v554_v57  ;;  %v528_v1 = vadd.f32 1.0, %v1222_v59 }
 0x224   :  { %v569_v58 = vpack.c.bf16 %v557_v54, %v553_v8  ;;  %v1224_v28 = vpop.eup %1223 }
 0x225   :  { %v571_v62 = vpack.c.bf16 %v559_v9, %v555_v56  ;;  %v530_v11 = vadd.f32 1.0, %v1224_v28  ;;  %v544_v22 = vmul.f32 0.5, %v528_v1 }
 0x226   :  { %871 = vmatprep.mubr.bf16.mxu0 %v569_v58 }
 0x227   :  { %v1226_v29 = vpop.eup %1225  ;;  %920 = vmatprep.mubr.bf16.mxu1 %v571_v62  ;;  %872 = vmatmul.mubr.bf16.vlgmr.msra.gmra.mxu0 %v568_v61  ;;  %v546_v31 = vmul.f32 0.5, %v530_v11  ;;  %v560_v41 = vmul.f32 %v544_v22, %v1582_v60 }
 0x228   :  { %v1228_v20 = vpop.eup %1227  ;;  %921 = vmatmul.mubr.bf16.vlgmr.msra.gmra.mxu1 %v570_v63  ;;  %v529_v12 = vadd.f32 1.0, %v1226_v29 }
 0x229   :  { %v1230_v36 = vpop.eup %1229  ;;  %v531_v23 = vadd.f32 1.0, %v1228_v20  ;;  %v562_v43 = vmul.f32 %v546_v31, %v1589_v10 }
 0x22a   :  { %v1232_v0 = vpop.eup %1231  ;;  %v532_v37 = vadd.f32 1.0, %v1230_v36  ;;  %v545_v14 = vmul.f32 0.5, %v529_v12 }
 0x22b   :  { %v534_v13 = vadd.f32 1.0, %v1232_v0  ;;  %v547_v21 = vmul.f32 0.5, %v531_v23 }
 0x22c   :  { %v1234_v16 = vpop.eup %1233  ;;  %v548_v17 = vmul.f32 0.5, %v532_v37  ;;  %v561_v34 = vmul.f32 %v545_v14, %v1597_v26 }
 0x22d   :  { %v1236_v18 = vpop.eup %1235  ;;  %v533_v19 = vadd.f32 1.0, %v1234_v16  ;;  %v550_v24 = vmul.f32 0.5, %v534_v13  ;;  %v563_v6 = vmul.f32 %v547_v21, %v1600_v27  ;;  %v999_v27 = vld [vmem:[%s1676_s6] ss:$0 sm:$0xff] }
 0x22e   :  { %v535_v25 = vadd.f32 1.0, %v1236_v18  ;;  %v564_v33 = vmul.f32 %v548_v17, %v1603_v15 }
 0x22f   :  { %v549_v30 = vmul.f32 0.5, %v533_v19  ;;  %v566_v38 = vmul.f32 %v550_v24, %v1614_v40 }
 0x230   :  { %v551_v32 = vmul.f32 0.5, %v535_v25  ;;  %v572_v46 = vpack.c.bf16 %v564_v33, %v560_v41 }
 0x231   :  { %v565_v35 = vmul.f32 %v549_v30, %v1620_v44  ;;  %v574_v47 = vpack.c.bf16 %v566_v38, %v562_v43 }
 0x232   :  { %v567_v39 = vmul.f32 %v551_v32, %v1626_v48 }
 0x233   :  { %v573_v42 = vpack.c.bf16 %v565_v35, %v561_v34 }
 0x234   :  { %v575_v45 = vpack.c.bf16 %v567_v39, %v563_v6 }
 0x235   :  { %879 = vmatprep.mubr.bf16.mxu0 %v573_v42 }
 0x236   :  { %928 = vmatprep.mubr.bf16.mxu1 %v575_v45  ;;  %880 = vmatmul.mubr.bf16.gmra.mxu0 %v572_v46 }
 0x237   :  { %929 = vmatmul.mubr.bf16.gmra.mxu1 %v574_v47 }
 0x2e7   :  { %v1076_v26 = vpop.f32.mrf.mxu0 }
 0x2e8   :  { %v1104_v15 = vpop.f32.mrf.mxu1 }
 0x2e9   :  { %v1077_v40 = vpop.f32.mrf.mxu0 }
 0x2ea   :  { %v1078_v44 = vadd.f32 %v1077_v40, %v1076_v26  ;;  %v1105_v48 = vpop.f32.mrf.mxu1 }
 0x2eb   :  { %v1079_v60 = vpop.f32.mrf.mxu0  ;;  %v1106_v50 = vadd.f32 %v1105_v48, %v1104_v15 }
 0x2ec   :  { %v874_v7 = vadd.f32 %v1078_v44, %v999_v27  ;;  %v1107_v49 = vpop.f32.mrf.mxu1 }
 0x2ed   :  { %v1080_v10 = vpop.f32.mrf.mxu0 }
 0x2ee   :  { %v1081_v51 = vadd.f32 %v1080_v10, %v1079_v60  ;;  %v1108_v52 = vpop.f32.mrf.mxu1  ;;  %v923_v53 = vadd.f32 %v1106_v50, %v874_v7 }
 0x2ef   :  { %v1109_v54 = vadd.f32 %v1108_v52, %v1107_v49 }
 0x2f0   :  { %v877_v8 = vadd.f32 %v1081_v51, %v999_v27  ;;  %v937_v56 = vadd.f32 %v1284_v2, %v923_v53 }
 0x2f2   :  { %v926_v55 = vadd.f32 %v1109_v54, %v877_v8 }
 0x2f4   :  { %v938_v9 = vadd.f32 %v1290_v4, %v926_v55 }
 0x2f6   :  { %v1051_v57 = vpack.c.bf16 %v938_v9, %v937_v56  ;;  %v1082_v58 = vpop.f32.mrf.mxu0 }
 0x2f7   :  { %v1110_v59 = vpop.f32.mrf.mxu1 }
 0x2f8   :  { %1052 = vst [vmem:[%s1677_s7] sm:$0xff] %v1051_v57   ;;  %v1083_v61 = vpop.f32.mrf.mxu0 }
 0x2f9   :  { %v1084_v62 = vadd.f32 %v1083_v61, %v1082_v58  ;;  %v1111_v28 = vpop.f32.mrf.mxu1 }
 0x2fa   :  { %v1085_v63 = vpop.f32.mrf.mxu0  ;;  %v1112_v12 = vadd.f32 %v1111_v28, %v1110_v59 }
 0x2fb   :  { %v882_v29 = vadd.f32 %v1084_v62, %v999_v27  ;;  %v1113_v20 = vpop.f32.mrf.mxu1 }
 0x2fc   :  { %v1086_v36 = vpop.f32.mrf.mxu0 }
 0x2fd   :  { %v1087_v0 = vadd.f32 %v1086_v36, %v1085_v63  ;;  %v1114_v23 = vpop.f32.mrf.mxu1  ;;  %v931_v2 = vadd.f32 %v1112_v12, %v882_v29 }
 0x2fe   :  { %v1115_v4 = vadd.f32 %v1114_v23, %v1113_v20 }
 0x2ff   :  { %v885_v1 = vadd.f32 %v1087_v0, %v999_v27  ;;  %v939_v11 = vadd.f32 %v1286_v3, %v931_v2 }
 0x301   :  { %v934_v37 = vadd.f32 %v1115_v4, %v885_v1 }
 0x303   :  { %v940_v13 = vadd.f32 %v1292_v5, %v934_v37 }
 0x305   :  { %v1056_v16 = vpack.c.bf16 %v940_v13, %v939_v11 }
 0x307   :  { %1059 = vst [vmem:[%s1677_s7 + $0x8] sm:$0xff] %v1056_v16  }

// kernel: shape_vae_forward.4
= control target key start
LH: loop header
LB: loop body
LE: loop exit
PB: predicated region body
PF: predicated region fallthrough
CT: control target
= control target key end

     0   :  { %s2188_s0 = inlined_call_operand.vmem [shape: bf16[2,16,128], index: 0, kind: input, shape index: {}, may-alias: {0,1}]   ;;  %s2189_s1 = inlined_call_operand.vmem [shape: bf16[2,16,128], index: 1, kind: input, shape index: {}, may-alias: {0,1}]   ;;  %s2190_s2 = inlined_call_operand.vmem [shape: f32[1,128], index: 2, kind: input, shape index: {}]   ;;  %s2191_s3 = inlined_call_operand.vmem [shape: f32[1,128], index: 3, kind: input, shape index: {}]   ;;  %s2192_s4 = inlined_call_operand.hbm [shape: bf16[4,128,128], index: 4, kind: input, shape index: {}]   ;;  %s2193_s5 = inlined_call_operand.vmem [shape: f32[4,1,128], index: 5, kind: input, shape index: {}]   ;;  %s2194_s6 = inlined_call_operand.hbm [shape: bf16[4,128,256], index: 6, kind: input, shape index: {}]   ;;  %s2195_s7 = inlined_call_operand.vmem [shape: f32[4,1,256], index: 7, kind: input, shape index: {}]   ;;  %s2196_s8 = inlined_call_operand.hbm [shape: bf16[4,128,128], index: 8, kind: input, shape index: {}]   ;;  %s2197_s9 = inlined_call_operand.vmem [shape: f32[1,128], index: 9, kind: input, shape index: {}]   ;;  %s2198_s10 = inlined_call_operand.vmem [shape: bf16[2,16,128], index: 10, kind: output, shape index: {}]  }
   0x1   :  { %2204 = sst [smem:[#allocation16_spill]] %s2192_s4 }
   0x2   :  { %2205 = sst [smem:[#allocation17_spill]] %s2193_s5 }
   0x3   :  { %2206 = sst [smem:[#allocation18_spill]] %s2194_s6 }
   0x4   :  { %2207 = sst [smem:[#allocation19_spill]] %s2197_s9 }
   0x5   :  { %15 = vsyncpa [#allocation4], 0 }
   0x6   :  { %17 = vsyncpa [#allocation4 + $0x1], 0 }
   0x7   :  { %18 = vsyncpa [#allocation6], 0 }
   0x8   :  { %20 = vsyncpa [#allocation6 + $0x1], 0  ;;  %s1889_s13 = smov 0   ;;  %s1891_s14 = smov 0  }
   0x9   :  { %s1893_s15 = smov 0   ;;  %s1895_s16 = smov 0  }
   0xa   :  { %s1897_s17 = smov 0   ;;  %s1899_s18 = smov 0  }
   0xb   :  { %s1901_s19 = smov 0   ;;  %s1903_s20 = smov 0  }
   0xc LB: > { %2208 = sst [smem:[#allocation10_spill]] %s1802_s15  ;;  %s2199_s21 = sadd.s32 4294967295, %s1822_s20   ;;  %s1822_s20 = sphi %s1903_s20, %s26_s20   ;;  %s1818_s19 = sphi %s1901_s19, %s2227_s19   ;;  %s1814_s18 = sphi %s1899_s18, %s2226_s18   ;;  %s1810_s17 = sphi %s1897_s17, %s2230_s17   ;;  %s1806_s16 = sphi %s1895_s16, %s2224_s16   ;;  %s1802_s15 = sphi %s1893_s15, %s2223_s15   ;;  %s1798_s14 = sphi %s1891_s14, %s2229_s14   ;;  %s1794_s13 = sphi %s1889_s13, %s2228_s13  }
   0xd   : > { %2209 = sst [smem:[#allocation11_spill]] %s1814_s18  ;;  %s38_s22 = sadd.s32 1, %s1814_s18 }
   0xe   : > { %2210 = sst [smem:[#allocation12_spill]] %s1818_s19  ;;  %p39_p0 = scmp.ge.s32.totalorder %s38_s22, 4 }
   0xf   : > { %s45_s23 = sadd.s32 1, %s1818_s19  ;;  %s148_s24 = sadd.s32 1, %s1802_s15 }
  0x10   : > { %p155_p1 = scmp.ne.s32.totalorder %s1802_s15, %s1798_s14  ;;  %s2232_s22 = smov (%p39_p0, %s38_s22), 0 }
  0x11   : > { %2211 = sst [smem:[#allocation13_spill]] %s2232_s22  ;;  %s2234_s23 = smov (!%p39_p0, %s45_s23), %s1818_s19 }
  0x12   : > { %s145_s25 = ssub.s32 %s1814_s18, %s2232_s22  ;;  %p156_p2 = scmp.eq.s32.totalorder %s1822_s20, 0 }
  0x13   : > { %p47_p3 = scmp.ge.s32.totalorder %s2234_s23, 2  ;;  %p146_p4 = scmp.eq.s32.totalorder %s145_s25, 0 }
  0x14   : > { %p157_p5 = por %p156_p2, %p155_p1  ;;  %p161_p6 = scmp.ne.s32.totalorder %s1798_s14, %s1794_s13 }
  0x15   : > { %s2236_s23 = smov (%p47_p3, %s2234_s23), 0  ;;  %p162_p7 = scmp.eq.s32.totalorder %s2199_s21, 0 }
  0x16   : > { %2212 = sst [smem:[#allocation14_spill]] %s2236_s23  ;;  %p1540_p8 = scmp.lt.s32.totalorder %s1822_s20, 8 }
  0x17   : > { %s1943_s26 = scalar_select %p146_p4, %s1802_s15, %s148_s24  }
  0x18   : > { %s1949_s27 = sand.u32 1, %s1802_s15   ;;  %p1951_p9 = por %p162_p7, %p161_p6 }
  0x19   : > { %2213 = sst [smem:[#allocation15_spill]] %s1943_s26  ;;  %s395_s29 = sand.u32 1, %s1822_s20  }
  0x1a   : > { %p1956_p10 = pnand %p1540_p8, %p157_p5  ;;  %s1369_s11 = sshll.u32 %s1949_s27, 7 }
  0x1b   : > { %s1430_s12 = sshll.u32 %s1814_s18, 11  ;;  %s2216_s6 = sld [smem:[#allocation18_spill]] }
  0x1c   : > { %s399_s21 = scalar_lea.vmem [#allocation5], %s1369_s11  ;;  %p1375_p11 = scmp.ge.s32.totalorder %s1822_s20, 1 }
  0x1d   : > { %s406_s23 = sshll.u32 %s399_s21, 4  ;;  %s1966_s22 = scalar_lea.sflag [#allocation6], %s395_s29  ;;  %s407_s23 = int_to_ptr.vmem [resolvable:$true] %s406_s23 }
  0x1e   : > { %p1670_p12 = pneg %p1956_p10  ;;  %s1681_s19 = scalar_lea.vmem %s407_s23, 2048 }
  0x1f   : > { %p1682_p13 = scmp.ne.s32.totalorder %s407_s23, %s1681_s19  ;;  %s1824_s26 = smov [#allocation5]  }
  0x20   : > { %s1686_s15 = sshll.u32 %s1824_s26, 4  ;;  %s1687_s15 = int_to_ptr.vmem [resolvable:$false] %s1686_s15 }
  0x21   : > { %s405_s25 = scalar_lea.hbm %s2216_s6, %s1430_s12  ;;  %p1684_p0 = pnand %p1682_p13, %p1670_p12 }
  0x22   : > { %s1688_s9 = scalar_lea.vmem %s1687_s15, 4096  ;;  %p1689_p2 = scmp.lt.s32.totalorder %s407_s23, %s1687_s15 }
  0x23   : > { %p1685_p1 = pneg %p1684_p0  ;;  %p1690_p3 = scmp.lt.s32.totalorder %s1688_s9, %s1681_s19 }
  0x25   : > { %p1691_p4 = por %p1690_p3, %p1689_p2 }
  0x27   : > { %p1692_p5 = pnand %p1691_p4, %p1685_p1 }
  0x29   : > { %1695 = shalt.err (!%p1692_p5)
}
  0x2a   : > { %s1825_s21 = smov 128   ;;  %s1826_s29 = smov 8  }
  0x2b   : > { %1536 = dma.hbm_to_vmem [thread:$0]  (!%p1956_p10), %s405_s25, 2048, %s407_s23, %s1966_s22, %s1825_s21, %s1825_s21, %s1826_s29  }
  0x2c   : > { %p442_p6 = scmp.lt.s32.totalorder %s1822_s20, 9  ;;  %s1366_s9 = sshll.u32 %s1949_s27, 6 }
  0x2d   : > { %s1429_s19 = sshll.u32 %s1814_s18, 10  ;;  %s2218_s4 = sld [smem:[#allocation16_spill]] }
  0x2e   : > { %p1979_p7 = pnand %p1375_p11, %p442_p6  ;;  %s372_s13 = scalar_lea.vmem [#allocation3], %s1366_s9 }
  0x2f   : > { %s379_s24 = sshll.u32 %s372_s13, 4  ;;  %s369_s6 = scalar_lea.sflag [#allocation4], %s1949_s27  ;;  %s380_s24 = int_to_ptr.vmem [resolvable:$true] %s379_s24 }
  0x30   : > { %s1709_s5 = scalar_lea.vmem %s380_s24, 1024  ;;  %s1827_s23 = smov [#allocation3]  }
  0x31   : > { %p1710_p8 = scmp.ne.s32.totalorder %s380_s24, %s1709_s5  ;;  %s1714_s25 = sshll.u32 %s1827_s23, 4  ;;  %s1715_s25 = int_to_ptr.vmem [resolvable:$false] %s1714_s25 }
  0x32   : > { %s1716_s21 = scalar_lea.vmem %s1715_s25, 2048  ;;  %p1717_p11 = scmp.lt.s32.totalorder %s380_s24, %s1715_s25 }
  0x33   : > { %s378_s12 = scalar_lea.hbm %s2218_s4, %s1429_s19  ;;  %p1712_p13 = pnand %p1710_p8, %p1670_p12 }
  0x34   : > { %p1718_p1 = scmp.lt.s32.totalorder %s1716_s21, %s1709_s5 }
  0x35   : > { %p1713_p0 = pneg %p1712_p13 }
  0x36   : > { %p1719_p2 = por %p1718_p1, %p1717_p11 }
  0x38   : > { %p1720_p3 = pnand %p1719_p2, %p1713_p0 }
  0x3a   : > { %1723 = shalt.err (!%p1720_p3)
}
  0x3b   : > { %s1828_s29 = smov 64   ;;  %s1829_s26 = smov 4  }
  0x3c   : > { %1533 = dma.hbm_to_vmem [thread:$0]  (!%p1956_p10), %s378_s12, 1024, %s380_s24, %s369_s6, %s1828_s29, %s1828_s29, %s1829_s26  }
  0x3d   : > { %s433_s13 = scalar_lea.hbm %s2196_s8, %s1429_s19  ;;  %s427_s4 = scalar_lea.vmem [#allocation7], %s1366_s9 }
  0x3e   : > { %s434_s18 = sshll.u32 %s427_s4, 4  ;;  %s1830_s5 = smov [#allocation7]   ;;  %s435_s18 = int_to_ptr.vmem [resolvable:$true] %s434_s18 }
  0x3f   : > { %s1737_s23 = scalar_lea.vmem %s435_s18, 1024  ;;  %s1742_s25 = sshll.u32 %s1830_s5, 4  ;;  %s1743_s25 = int_to_ptr.vmem [resolvable:$false] %s1742_s25 }
  0x40   : > { %p1738_p4 = scmp.ne.s32.totalorder %s435_s18, %s1737_s23  ;;  %s1744_s21 = scalar_lea.vmem %s1743_s25, 2048 }
  0x41   : > { %p1745_p8 = scmp.lt.s32.totalorder %s435_s18, %s1743_s25  ;;  %p1746_p13 = scmp.lt.s32.totalorder %s1744_s21, %s1737_s23 }
  0x42   : > { %p1740_p5 = pnand %p1738_p4, %p1670_p12 }
  0x43   : > { %p1747_p0 = por %p1746_p13, %p1745_p8 }
  0x44   : > { %p1741_p6 = pneg %p1740_p5 }
  0x46   : > { %p1748_p11 = pnand %p1747_p0, %p1741_p6 }
  0x48   : > { %1751 = shalt.err (!%p1748_p11)
}
  0x49   : > { %1539 = dma.hbm_to_vmem [thread:$0]  (!%p1956_p10), %s433_s13, 1024, %s435_s18, %s1966_s22, %s1828_s29, %s1828_s29, %s1829_s26  }
  0x4a   : > { %446 = sbr.rel (%p1979_p7) target bundleno = 1546 (0x60a), region = 60  ;;  %s2006_s4 = sand.u32 (!%p1979_p7), 1, %s1798_s14  }
  0x4b   : > { %s1376_s6 = sshll.u32 (!%p1979_p7), %s2006_s4, 6  ;;  %s449_s9 = scalar_lea.sflag (!%p1979_p7), [#allocation4], %s2006_s4 }
  0x4c   : > { %s2012_s19 = scalar_lea.vmem (!%p1979_p7), [#allocation3], %s1376_s6 }
  0x4f   : > { %1785 = dma.done.wait (%p1951_p9), %s449_s9, 1024  }
  0x50   : > { %1787 = vsyncadd (%p1951_p9), %s449_s9, 4294966272  ;;  %s2219_s18 = sadd.s32 4294967295, %s1822_s20   ;;  %s1377_s30 = sshll.u32 %s2006_s4, 7 }
  0x51   : > { %s457_s22 = sand.u32 1, %s2219_s18   ;;  %s2021_s12 = scalar_lea.vmem [#allocation5], %s1377_s30 }
  0x52   : > { %s458_s15 = scalar_lea.sflag [#allocation6], %s457_s22 }
  0x53   : > { %1789 = dma.done.wait (%p1951_p9), %s458_s15, 3072  }
  0x54   : > { %1791 = vsyncadd (%p1951_p9), %s458_s15, 4294964224  ;;  %p543_p10 = scmp.lt.s32.totalorder %s1810_s17, 1  ;;  %v1612_v6 = vld [vmem:[%s2021_s12 + $0x74] ss:$8 sps:$4 sm:$0xff]   ;;  %v1614_v7 = vld [vmem:[%s2021_s12 + $0x70] ss:$8 sps:$4 sm:$0xff]  }
  0x55   : > { %873 = vmatprep.subr.bf16.mxu1 %v1612_v6  ;;  %v1615_v24 = vld [vmem:[%s2021_s12 + $0x64] ss:$8 sps:$4 sm:$0xff]   ;;  %v1617_v25 = vld [vmem:[%s2012_s19 + $0x38] sm:$0xff]   ;;  %v1618_v26 = vld [vmem:[%s2021_s12 + $0x60] ss:$8 sps:$4 sm:$0xff]   ;;  %v1831_v27 = vmov 0.0  }
  0x56   : > { %s2238_s17 = smov (!%p543_p10, %s1810_s17), 1  ;;  %874 = vmatpush1.bf16.msra.mxu1 %v1614_v7  ;;  %1472 = vmatprep.subr.bf16.mxu0 %v1831_v27  ;;  %v1619_v28 = vld [vmem:[%s2021_s12 + $0x54] ss:$8 sps:$4 sm:$0xff]   ;;  %v1622_v30 = vld [vmem:[%s2021_s12 + $0x50] ss:$8 sps:$4 sm:$0xff]   ;;  %v1625_v32 = vld [vmem:[%s2012_s19 + $0x28] sm:$0xff]  }
  0x57   : > { %s2029_s24 = sshll.u32 %s2238_s17, 3  ;;  %875 = vmatprep.subr.bf16.mxu1 %v1615_v24  ;;  %1473 = vmatpush3.bf16.msra.mxu0 %v1617_v25  ;;  %v1621_v29 = vld [vmem:[%s2012_s19 + $0x30] sm:$0xff]   ;;  %v1623_v31 = vld [vmem:[%s2021_s12 + $0x44] ss:$8 sps:$4 sm:$0xff]   ;;  %v1626_v33 = vld [vmem:[%s2021_s12 + $0x40] ss:$8 sps:$4 sm:$0xff]  }
  0x58   : > { %s556_s27 = scalar_lea.vmem %s2189_s1, %s2029_s24  ;;  %s572_s28 = scalar_lea.vmem %s2198_s10, %s2029_s24  ;;  %1474 = vmatprep.subr.bf16.mxu0 %v1831_v27  ;;  %v1627_v34 = vld [vmem:[%s2021_s12 + $0x34] ss:$8 sps:$4 sm:$0xff]   ;;  %v1629_v35 = vld [vmem:[%s2012_s19 + $0x20] sm:$0xff]   ;;  %v1630_v36 = vld [vmem:[%s2021_s12 + $0x30] ss:$8 sps:$4 sm:$0xff]   ;;  %v1832_v38 = vmov 0  }
  0x59   : > { %s550_s25 = scalar_lea.vmem %s2188_s0, %s2029_s24  ;;  %v1442_v0 = vld [vmem:[%s556_s27] sm:$0xff]   ;;  %v1631_v37 = vld [vmem:[%s2021_s12 + $0x24] ss:$8 sps:$4 sm:$0xff]   ;;  %905 = vmatprep.mubr.bf16.mxu1 %v1832_v38  ;;  %v1633_v39 = vld [vmem:[%s2012_s19 + $0x18] sm:$0xff]   ;;  %vm1833_vm0 = vmmov 0   ;;  %p557_p9 = scmp.lt.s32.totalorder %s1806_s16, 3 }
  0x5a   : > { %v1438_v1 = vld [vmem:[%s550_s25] sm:$0xff]   ;;  %v1443_v2 = vunpack.c.l.bf16 %v1442_v0  ;;  %v1444_v4 = vunpack.c.h.bf16 %v1442_v0  ;;  %876 = vmatpush1.bf16.msra.mxu1 %v1618_v26  ;;  %v1634_v40 = vld [vmem:[%s2021_s12 + $0x20] ss:$8 sps:$4 sm:$0xff]   ;;  %v1639_v44 = vld [vmem:[%s2021_s12 + $0x4] ss:$8 sps:$4 sm:$0xff]   ;;  %1488 = vmatprep.mubr.msk.bf16.mxu0 %vm1833_vm0, %v1831_v27  ;;  %s2220_s27 = sld [smem:[#allocation17_spill]] }
  0x5b   : > { %v2043_v3 = vunpack.c.l.bf16 %v1438_v1  ;;  %v2046_v5 = vunpack.c.h.bf16 %v1438_v1  ;;  %877 = vmatprep.subr.bf16.mxu1 %v1619_v28  ;;  %1475 = vmatpush3.bf16.msra.mxu0 %v1621_v29  ;;  %v1635_v41 = vld [vmem:[%s2021_s12 + $0x14] ss:$8 sps:$4 sm:$0xff]   ;;  %v1638_v43 = vld [vmem:[%s2021_s12 + $0x10] ss:$8 sps:$4 sm:$0xff]   ;;  %v1641_v45 = vld [vmem:[%s2012_s19 + $0x8] sm:$0xff]   ;;  %s558_s18 = scalar_select %p557_p9, %s1806_s16, 3 }
  0x5c   : > { %625 = vadd.xlane.f32.xlu0 %v1443_v2  ;;  %1476 = vmatprep.subr.bf16.mxu0 %v1831_v27  ;;  %v1637_v42 = vld [vmem:[%s2012_s19 + $0x10] sm:$0xff]   ;;  %v1642_v46 = vld [vmem:[%s2021_s12] ss:$8 sps:$4 sm:$0xff]   ;;  %vm959_vm1 = vcmask 130048   ;;  %s2134_s13 = scalar_lea.vmem [#allocation7], %s1376_s6  ;;  %p1422_p12 = scmp.ne.s32.totalorder %s1806_s16, 0 }
  0x5d   : > { %581 = vadd.xlane.f32.xlu1 %v2043_v3  ;;  %v1643_v47 = vld [vmem:[%s2012_s19] sm:$0xff]   ;;  %v1386_v62 = vld [vmem:[%s2190_s2] ss:$0 sm:$0xff]  ;;  %s1383_s22 = sshll.u32 %s558_s18, 1  ;;  %s2221_s23 = sld [smem:[#allocation19_spill]] (!%p1422_p12) }
  0x5e   : > { %878 = vmatpush1.bf16.msra.mxu1 %v1622_v30  ;;  %v1387_v6 = vld [vmem:[%s2191_s3] ss:$0 sm:$0xff]  ;;  %s563_s12 = scalar_lea.vmem %s2195_s7, %s1383_s22 }
  0x5f   : > { %879 = vmatprep.subr.bf16.mxu1 %v1623_v31  ;;  %1477 = vmatpush3.bf16.msra.mxu0 %v1625_v32 }
  0x60   : > { %627 = vadd.xlane.f32.xlu0 %v1444_v4  ;;  %1478 = vmatprep.subr.bf16.mxu0 %v1831_v27  ;;  %s559_s11 = scalar_lea.vmem %s2220_s27, %s558_s18 }
  0x61   : > { %583 = vadd.xlane.f32.xlu1 %v2046_v5 }
  0x62   : > { %880 = vmatpush1.bf16.msra.mxu1 %v1626_v33 }
  0x63   : > { %881 = vmatprep.subr.bf16.mxu1 %v1627_v34  ;;  %1479 = vmatpush3.bf16.msra.mxu0 %v1629_v35 }
  0x64   : > { %1480 = vmatprep.subr.bf16.mxu0 %v1831_v27 }
  0x66   : > { %882 = vmatpush1.bf16.msra.mxu1 %v1630_v36  ;;  %v1388_v36 = vld [vmem:[%s559_s11] ss:$0 sm:$0xff] }
  0x67   : > { %883 = vmatprep.subr.bf16.mxu1 %v1631_v37  ;;  %1481 = vmatpush3.bf16.msra.mxu0 %v1633_v39 }
  0x68   : > { %1482 = vmatprep.subr.bf16.mxu0 %v1831_v27 }
  0x6a   : > { %884 = vmatpush1.bf16.msra.mxu1 %v1634_v40 }
  0x6b   : > { %885 = vmatprep.subr.bf16.mxu1 %v1635_v41  ;;  %1483 = vmatpush3.bf16.msra.mxu0 %v1637_v42 }
  0x6c   : > { %1484 = vmatprep.subr.bf16.mxu0 %v1831_v27 }
  0x6e   : > { %886 = vmatpush1.bf16.msra.mxu1 %v1638_v43 }
  0x6f   : > { %887 = vmatprep.subr.bf16.mxu1 %v1639_v44  ;;  %1485 = vmatpush3.bf16.msra.mxu0 %v1641_v45 }
  0x70   : > { %1486 = vmatprep.subr.bf16.mxu0 %v1831_v27 }
  0x72   : > { %888 = vmatpush1.bf16.msra.mxu1 %v1642_v46 }
  0x73   : > { %1492 = vmatprep.subr.bf16.mxu1 %v1831_v27  ;;  %1487 = vmatpush3.bf16.msra.mxu0 %v1643_v47 }
  0x74   : > { %1504 = vmatprep.subr.bf16.mxu0 %v1831_v27 }
  0xe5   : > { %v626_v8 = vpop.xlane.xlu0 %625 }
  0xe6   : > { %v582_v9 = vpop.xlane.xlu1 %581  ;;  %v629_v10 = vmul.f32 0.0078125, %v626_v8 }
  0xe7   : > { %v586_v11 = vmul.f32 0.0078125, %v582_v9 }
  0xe8   : > { %v2051_v12 = vsub.f32 %v1443_v2, %v629_v10 }
  0xe9   : > { %v2054_v13 = vsub.f32 %v2043_v3, %v586_v11  ;;  %v628_v14 = vpop.xlane.xlu0 %627 }
  0xea   : > { %v584_v15 = vpop.xlane.xlu1 %583  ;;  %v630_v16 = vmul.f32 0.0078125, %v628_v14  ;;  %v633_v17 = vmul.f32 %v2051_v12, %v2051_v12 }
  0xeb   : > { %v587_v18 = vmul.f32 0.0078125, %v584_v15  ;;  %v590_v21 = vmul.f32 %v2054_v13, %v2054_v13 }
  0xec   : > { %v2058_v19 = vsub.f32 %v1444_v4, %v630_v16  ;;  %635 = vadd.xlane.f32.xlu0 %v633_v17 }
  0xed   : > { %v2061_v20 = vsub.f32 %v2046_v5, %v587_v18  ;;  %v783_v18 = vlaneseq }
  0xee   : > { %v634_v22 = vmul.f32 %v2058_v19, %v2058_v19 }
  0xef   : > { %v591_v23 = vmul.f32 %v2061_v20, %v2061_v20 }
  0xf0   : > { %637 = vadd.xlane.f32.xlu1 %v634_v22  ;;  %592 = vadd.xlane.f32.xlu0 %v590_v21  ;;  %v781_v21 = vld [vmem:[%s563_s12] sm:$0x3] }
  0xf4   : > { %594 = vadd.xlane.f32.xlu1 %v591_v23 }
 0x175   : > { %v636_v48 = vpop.xlane.xlu0 %635 }
 0x176   : > { %v639_v49 = vmul.f32 0.0078125, %v636_v48 }
 0x178   : > { %v641_v50 = vadd.f32 1e-05, %v639_v49 }
 0x179   : > { %v593_v51 = vpop.xlane.xlu0 %592  ;;  %v638_v52 = vpop.xlane.xlu1 %637 }
 0x17a   : > { %1652 = vrsqrt.f32 %v641_v50  ;;  %v596_v53 = vmul.f32 0.0078125, %v593_v51  ;;  %v640_v54 = vmul.f32 0.0078125, %v638_v52 }
 0x17c   : > { %v598_v55 = vadd.f32 1e-05, %v596_v53  ;;  %v642_v56 = vadd.f32 1e-05, %v640_v54 }
 0x17d   : > { %v595_v57 = vpop.xlane.xlu1 %594 }
 0x17e   : > { %1654 = vrsqrt.f32 %v598_v55  ;;  %v597_v58 = vmul.f32 0.0078125, %v595_v57 }
 0x17f   : > { %1656 = vrsqrt.f32 %v642_v56 }
 0x180   : > { %v599_v59 = vadd.f32 1e-05, %v597_v58 }
 0x182   : > { %1658 = vrsqrt.f32 %v599_v59 }
 0x187   : > { %v1653_v60 = vpop.eup %1652 }
 0x188   : > { %v645_v61 = vmul.f32 %v1653_v60, %v2051_v12  ;;  %v1644_v60 = vld [vmem:[%s2134_s13 + $0x38] sm:$0xff]  }
 0x18a   : > { %v647_v4 = vmul.f32 %v1386_v62, %v645_v61  ;;  %v1645_v61 = vld [vmem:[%s2134_s13 + $0x30] sm:$0xff]  }
 0x18b   : > { %v1655_v63 = vpop.eup %1654 }
 0x18c   : > { %v1657_v0 = vpop.eup %1656  ;;  %v602_v1 = vmul.f32 %v1655_v63, %v2054_v13  ;;  %v649_v11 = vadd.f32 %v1387_v6, %v647_v4  ;;  %v1647_v63 = vld [vmem:[%s2134_s13 + $0x20] sm:$0xff]  }
 0x18d   : > { %v646_v2 = vmul.f32 %v1657_v0, %v2058_v19  ;;  %v784_v19 = vshrl.u32 %v783_v18, 7  ;;  %v1648_v0 = vld [vmem:[%s2134_s13 + $0x18] sm:$0xff]  }
 0x18e   : > { %v610_v10 = vmul.f32 %v1386_v62, %v602_v1  ;;  %v1649_v1 = vld [vmem:[%s2134_s13 + $0x10] sm:$0xff]  }
 0x18f   : > { %v1659_v7 = vpop.eup %1658  ;;  %v648_v8 = vmul.f32 %v1386_v62, %v646_v2  ;;  %v789_v29 = vsub.s32 1, %v784_v19 }
 0x190   : > { %v603_v9 = vmul.f32 %v1659_v7, %v2061_v20  ;;  %v618_v16 = vadd.f32 %v1387_v6, %v610_v10  ;;  %v785_v20 = vsub.s32 0, %v784_v19 }
 0x191   : > { %v650_v12 = vadd.f32 %v1387_v6, %v648_v8  ;;  %v790_v35 = vrot.slane %v781_v21, %v789_v29 }
 0x192   : > { %v611_v14 = vmul.f32 %v1386_v62, %v603_v9  ;;  %v786_v23 = vrot.slane %v781_v21, %v785_v20  ;;  %v1646_v62 = vld [vmem:[%s2134_s13 + $0x28] sm:$0xff]  }
 0x193   : > { %v651_v15 = vpack.c.bf16 %v650_v12, %v649_v11  ;;  %v1650_v11 = vld [vmem:[%s2134_s13 + $0x8] sm:$0xff]   ;;  %v1651_v12 = vld [vmem:[%s2134_s13] sm:$0xff]  }
 0x194   : > { %v619_v13 = vadd.f32 %v1387_v6, %v611_v14 }
 0x195   : > { %906 = vmatmul.mubr.bf16.vlgmr.msra.gmra.mxu1 %v651_v15 }
 0x196   : > { %v620_v17 = vpack.c.bf16 %v619_v13, %v618_v16  ;;  %1494 = vmatprep.mubr.msk.bf16.mxu1 %vm1833_vm0, %v1831_v27 }
 0x198   : > { %1489 = vmatmul.mubr.bf16.vlgmr.msra.gmra.mxu0 %v620_v17 }
 0x199   : > { %1520 = vmatprep.mubr.msk.bf16.mxu0 %vm1833_vm0, %v1831_v27  ;;  %1505 = vmatpush3.bf16.msra.mxu0 %v1644_v60 }
 0x19a   : > { %1506 = vmatprep.subr.bf16.mxu0 %v1831_v27 }
 0x19d   : > { %1507 = vmatpush3.bf16.msra.mxu0 %v1645_v61 }
 0x19e   : > { %1508 = vmatprep.subr.bf16.mxu0 %v1831_v27 }
 0x1a1   : > { %1509 = vmatpush3.bf16.msra.mxu0 %v1646_v62 }
 0x1a2   : > { %1510 = vmatprep.subr.bf16.mxu0 %v1831_v27 }
 0x1a5   : > { %1511 = vmatpush3.bf16.msra.mxu0 %v1647_v63 }
 0x1a6   : > { %1512 = vmatprep.subr.bf16.mxu0 %v1831_v27 }
 0x1a9   : > { %1513 = vmatpush3.bf16.msra.mxu0 %v1648_v0 }
 0x1aa   : > { %1514 = vmatprep.subr.bf16.mxu0 %v1831_v27 }
 0x1ad   : > { %1515 = vmatpush3.bf16.msra.mxu0 %v1649_v1 }
 0x1ae   : > { %1516 = vmatprep.subr.bf16.mxu0 %v1831_v27 }
 0x1b1   : > { %1517 = vmatpush3.bf16.msra.mxu0 %v1650_v11 }
 0x1b2   : > { %1518 = vmatprep.subr.bf16.mxu0 %v1831_v27 }
 0x1b5   : > { %1519 = vmatpush3.bf16.msra.mxu0 %v1651_v12 }
 0x255   : > { %v907_v22 = vpop.f32.mrf.mxu1 }
 0x256   : > { %v908_v28 = vadd.f32 %v907_v22, %v786_v23 }
 0x257   : > { %v909_v24 = vpop.f32.mrf.mxu1 }
 0x258   : > { %v757_v25 = vpop.f32.mrf.mxu0  ;;  %v910_v41 = vadd.f32 %v909_v24, %v790_v35 }
 0x259   : > { %v911_v26 = vpop.f32.mrf.mxu1  ;;  %v758_v40 = vadd.f32 %v1388_v36, %v757_v25 }
 0x25a   : > { %v912_v30 = vadd.f32 %v911_v26, %v786_v23  ;;  %v1490_v31 = vpop.f32.mrf.mxu0 }
 0x25b   : > { %v913_v34 = vpop.f32.mrf.mxu1 }
 0x25c   : > { %v916_v32 = vpack.c.bf16 %v912_v30, %v908_v28  ;;  %v760_v33 = vpop.f32.mrf.mxu0  ;;  %v914_v39 = vadd.f32 %v913_v34, %v790_v35 }
 0x25d   : > { %v761_v38 = vadd.f32 %v1388_v36, %v760_v33 }
 0x25e   : > { %1493 = vmatpush3.bf16.xpose.msra.mxu1 %v916_v32  ;;  %v1491_v37 = vpop.f32.mrf.mxu0  ;;  %v917_v43 = vpack.c.bf16 %v914_v39, %v910_v41 }
 0x25f   : > { %1498 = vmatprep.subr.bf16.mxu1 %v1831_v27  ;;  %v764_v42 = vpack.c.bf16 %v761_v38, %v758_v40 }
 0x265   : > { %1495 = vmatmul.mubr.bf16.vlgmr.msra.gmra.mxu1 %v764_v42 }
 0x266   : > { %1499 = vmatpush3.bf16.msra.mxu1 %v917_v43  ;;  %1500 = vmatprep.mubr.msk.bf16.mxu1 %vm1833_vm0, %v1831_v27 }
 0x325   : > { %v952_v44 = vpop.f32.mrf.mxu1 }
 0x326   : > { %v960_v45 = vsel %vm959_vm1, %v952_v44, -inf }
 0x327   : > { %961 = vmax.xlane.f32.xlu0 %v960_v45  ;;  %v1496_v46 = vpop.f32.mrf.mxu1 }
 0x329   : > { %v955_v47 = vpop.f32.mrf.mxu1 }
 0x32a   : > { %v963_v48 = vsel %vm959_vm1, %v955_v47, -inf }
 0x32b   : > { %964 = vmax.xlane.f32.xlu1 %v963_v48  ;;  %v1497_v49 = vpop.f32.mrf.mxu1 }
 0x3b0   : > { %v962_v50 = vpop.xlane.xlu0 %961 }
 0x3b1   : > { %v966_v51 = vsub.f32 %v952_v44, %v962_v50 }
 0x3b3   : > { %v968_v52 = vmul.f32 1.442695, %v966_v51 }
 0x3b4   : > { %v965_v53 = vpop.xlane.xlu1 %964 }
 0x3b5   : > { %1660 = vpow2.f32 %v968_v52  ;;  %v967_v54 = vsub.f32 %v955_v47, %v965_v53 }
 0x3b7   : > { %v970_v55 = vmul.f32 1.442695, %v967_v54 }
 0x3b9   : > { %1662 = vpow2.f32 %v970_v55 }
 0x3c2   : > { %v1661_v56 = vpop.eup %1660 }
 0x3c3   : > { %v972_v57 = vsel %vm959_vm1, %v1661_v56, 0.0 }
 0x3c4   : > { %973 = vadd.xlane.f32.xlu0 %v972_v57 }
 0x3c6   : > { %v1663_v58 = vpop.eup %1662 }
 0x3c7   : > { %v975_v59 = vsel %vm959_vm1, %v1663_v58, 0.0 }
 0x3c8   : > { %976 = vadd.xlane.f32.xlu1 %v975_v59 }
 0x44d   : > { %v974_v2 = vpop.xlane.xlu0 %973 }
 0x44e   : > { %1664 = vrcp.f32 %v974_v2 }
 0x451   : > { %v977_v4 = vpop.xlane.xlu1 %976 }
 0x452   : > { %1666 = vrcp.f32 %v977_v4 }
 0x45b   : > { %v1665_v6 = vpop.eup %1664 }
 0x45c   : > { %v980_v8 = vmul.f32 %v1665_v6, %v1661_v56 }
 0x45f   : > { %v1667_v7 = vpop.eup %1666 }
 0x460   : > { %v981_v9 = vmul.f32 %v1667_v7, %v1663_v58 }
 0x462   : > { %v982_v10 = vpack.c.bf16 %v981_v9, %v980_v8 }
 0x464   : > { %1501 = vmatmul.mubr.msk.bf16.vlgmr.msra.gmra.mxu1 %vm959_vm1, %v982_v10 }
 0x524   : > { %v1020_v14 = vpop.f32.mrf.mxu1 }
 0x526   : > { %v1502_v15 = vpop.f32.mrf.mxu1 }
 0x528   : > { %v1023_v16 = vpop.f32.mrf.mxu1 }
 0x529   : > { %v1027_v13 = vpack.c.bf16 %v1023_v16, %v1020_v14 }
 0x52a   : > { %v1503_v17 = vpop.f32.mrf.mxu1 }
 0x52b   : > { %1521 = vmatmul.mubr.bf16.vlgmr.msra.gmra.mxu0 %v1027_v13 }
 0x5eb   : > { %v1126_v18 = vpop.f32.mrf.mxu0 }
 0x5ed   : > { %v1522_v19 = vpop.f32.mrf.mxu0  ;;  %1136 = sbr.rel (%p1422_p12) target bundleno = 1526 (0x5f6), region = 76 }
 0x5ef   : > { %v1129_v20 = vpop.f32.mrf.mxu0 }
 0x5f1   : > { %v1523_v21 = vpop.f32.mrf.mxu0 }
 0x5f2   : > { %v1423_v22 = vld [vmem:[%s2221_s23] ss:$0 sm:$0xff] }
 0x5f3   : > { %v1144_v27 = vadd.f32 %v2043_v3, %v1423_v22  ;;  %v1145_v23 = vadd.f32 %v2046_v5, %v1423_v22 }
 0x5f5   : > { %1146 = vst [vmem:[#allocation2] sm:$0xff] %v1144_v27  ;;  %1147 = vst [vmem:[#allocation2 + $0x8] sm:$0xff] %v1145_v23 }
 0x5f6 PF: > { %p1424_p7 = scmp.ne.s32.totalorder %s1806_s16, 3 }
 0x5fb   : > { %1157 = sbr.rel (%p1424_p7) target bundleno = 1546 (0x60a), region = 80 }
 0x5fc   : > { %v1148_v24 = vld [vmem:[#allocation2] sm:$0xff]  ;;  %v1149_v25 = vld [vmem:[#allocation2 + $0x8] sm:$0xff] }
 0x5fd   : > { %v1150_v26 = vadd.f32 %v1148_v24, %v1126_v18  ;;  %v1151_v28 = vadd.f32 %v1149_v25, %v1129_v20 }
 0x5ff   : > { %1152 = vst [vmem:[#allocation2] sm:$0xff] %v1150_v26  ;;  %1153 = vst [vmem:[#allocation2 + $0x8] sm:$0xff] %v1151_v28 }
 0x606   : > { %v1158_v29 = vld [vmem:[#allocation2] sm:$0xff]  ;;  %v1159_v30 = vld [vmem:[#allocation2 + $0x8] sm:$0xff] }
 0x607   : > { %v1448_v31 = vpack.c.bf16 %v1159_v30, %v1158_v29 }
 0x609   : > { %1449 = vst [vmem:[%s572_s28] sm:$0xff] %v1448_v31  }
 0x60a PF: > { %s26_s20 = sadd.s32 1, %s1822_s20   ;;  %s2222_s17 = sld [smem:[#allocation10_spill]] }
 0x60b   : > { %p23_p1 = scmp.ge.s32.totalorder %s26_s20, 10   ;;  %s2223_s15 = sld [smem:[#allocation15_spill]] }
 0x60c   : > { %s2224_s16 = sld [smem:[#allocation11_spill]]  ;;  %s2228_s13 = smov %s1798_s14 }
 0x60d   : > { %s2225_s21 = sld [smem:[#allocation12_spill]] }
 0x60e   : > { %s2226_s18 = sld [smem:[#allocation13_spill]] }
 0x60f   : > { %s2227_s19 = sld [smem:[#allocation14_spill]]  ;;  %25 = sbr.rel (!%p23_p1) target bundleno = 12 (0xc), region = 144 }
 0x610   : > { %s2229_s14 = smov %s2222_s17 }
 0x613   : > { %s2230_s17 = smov %s2225_s21 }
 0x614   :  { %1200 = vsyncpa [#allocation4], 1 }
 0x615   :  { %1202 = vsyncpa [#allocation4 + $0x1], 1 }
 0x616   :  { %1203 = vsyncpa [#allocation6], 1 }
 0x617   :  { %1205 = vsyncpa [#allocation6 + $0x1], 1 }

// kernel: shape_vae_forward.6
= control target key start
LH: loop header
LB: loop body
LE: loop exit
PB: predicated region body
PF: predicated region fallthrough
CT: control target
= control target key end

     0   :  { %s1628_s13 = smov 0   ;;  %s1630_s14 = smov 0   ;;  %s1827_s0 = inlined_call_operand.vmem [shape: bf16[2,16,128], index: 0, kind: input, shape index: {}, may-alias: {0,1}]   ;;  %s1828_s1 = inlined_call_operand.vmem [shape: bf16[2,16,128], index: 1, kind: input, shape index: {}, may-alias: {0,1}]   ;;  %s1829_s2 = inlined_call_operand.vmem [shape: f32[1,128], index: 2, kind: input, shape index: {}]   ;;  %s1830_s3 = inlined_call_operand.vmem [shape: f32[1,128], index: 3, kind: input, shape index: {}]   ;;  %s1831_s4 = inlined_call_operand.vmem [shape: bf16[4,128,128], index: 4, kind: input, shape index: {}]   ;;  %s1832_s5 = inlined_call_operand.vmem [shape: f32[4,1,128], index: 5, kind: input, shape index: {}]   ;;  %s1833_s6 = inlined_call_operand.vmem [shape: bf16[4,128,256], index: 6, kind: input, shape index: {}]   ;;  %s1834_s7 = inlined_call_operand.vmem [shape: f32[4,1,256], index: 7, kind: input, shape index: {}]   ;;  %s1835_s8 = inlined_call_operand.vmem [shape: bf16[4,128,128], index: 8, kind: input, shape index: {}]   ;;  %s1836_s9 = inlined_call_operand.vmem [shape: f32[1,128], index: 9, kind: input, shape index: {}]   ;;  %s1837_s10 = inlined_call_operand.vmem [shape: bf16[2,16,128], index: 10, kind: output, shape index: {}]  }
   0x1   :  { %s1632_s15 = smov 0   ;;  %s1634_s16 = smov 0  }
   0x2   :  { %s1636_s17 = smov 0  }
   0x3 LB: > { %s32_s18 = sadd.s32 1, %s1560_s15  ;;  %s39_s19 = sadd.s32 1, %s1564_s16  ;;  %s1568_s17 = sphi %s1636_s17, %s20_s17   ;;  %s1564_s16 = sphi %s1634_s16, %s1841_s16   ;;  %s1560_s15 = sphi %s1632_s15, %s1840_s15   ;;  %s1556_s14 = sphi %s1630_s14, %s1839_s14   ;;  %s1552_s13 = sphi %s1628_s13, %s1838_s13  }
   0x4   : > { %p33_p0 = scmp.ge.s32.totalorder %s32_s18, 4  ;;  %p1279_p1 = scmp.ge.s32.totalorder %s1568_s17, 1 }
   0x5   : > { %p397_p2 = scmp.lt.s32.totalorder %s1568_s17, 9 }
   0x6   : > { %s1843_s18 = smov (%p33_p0, %s32_s18), 0  ;;  %s1845_s19 = smov (!%p33_p0, %s39_s19), %s1564_s16 }
   0x7   : > { %p398_p3 = pnand %p1279_p1, %p397_p2  ;;  %p41_p4 = scmp.ge.s32.totalorder %s1845_s19, 2 }
   0x8   : > { %p471_p5 = scmp.lt.s32.totalorder (!%p398_p3), %s1556_s14, 1  ;;  %p485_p6 = scmp.lt.s32.totalorder (!%p398_p3), %s1552_s13, 3 }
   0x9   : > { %s1847_s19 = smov (%p41_p4, %s1845_s19), 0  ;;  %401 = sbr.rel (%p398_p3) target bundleno = 1474 (0x5c2), region = 60 }
   0xa   : > { %p1329_p7 = scmp.ne.s32.totalorder (!%p398_p3), %s1552_s13, 0 }
   0xe   : > { %s1849_s14 = smov (!%p471_p5, %s1556_s14), 1  ;;  %v1570_v26 = vmov 0.0   ;;  %v1571_v38 = vmov 0   ;;  %vm1572_vm0 = vmmov 0   ;;  %v1293_v62 = vld [vmem:[%s1829_s2] ss:$0 sm:$0xff] }
   0xf   : > { %s1660_s20 = sshll.u32 %s1849_s14, 3  ;;  %1379 = vmatprep.subr.bf16.mxu0 %v1570_v26  ;;  %848 = vmatprep.mubr.bf16.mxu1 %v1571_v38  ;;  %vm902_vm1 = vcmask 130048  }
  0x10   : > { %s484_s23 = scalar_lea.vmem %s1828_s1, %s1660_s20  ;;  %s515_s26 = scalar_lea.vmem %s1837_s10, %s1660_s20  ;;  %1395 = vmatprep.mubr.msk.bf16.mxu0 %vm1572_vm0, %v1570_v26 }
  0x11   : > { %v1349_v0 = vld [vmem:[%s484_s23] sm:$0xff]   ;;  %s478_s29 = scalar_lea.vmem %s1827_s0, %s1660_s20 }
  0x12   : > { %v1350_v1 = vunpack.c.l.bf16 %v1349_v0  ;;  %v1345_v2 = vld [vmem:[%s478_s29] sm:$0xff]   ;;  %v1351_v4 = vunpack.c.h.bf16 %v1349_v0  ;;  %s1682_s30 = scalar_select %p485_p6, %s1552_s13, 3 }
  0x13   : > { %v1674_v3 = vunpack.c.l.bf16 %v1345_v2  ;;  %v1677_v5 = vunpack.c.h.bf16 %v1345_v2 }
  0x14   : > { %568 = vadd.xlane.f32.xlu0 %v1350_v1  ;;  %s1339_s11 = sshll.u32 %s1682_s30, 7  ;;  %s1338_s22 = sshll.u32 %s1682_s30, 6 }
  0x15   : > { %524 = vadd.xlane.f32.xlu1 %v1674_v3  ;;  %s1688_s21 = scalar_lea.vmem %s1833_s6, %s1339_s11  ;;  %s1715_s25 = scalar_lea.vmem %s1831_s4, %s1338_s22 }
  0x16   : > { %v1474_v6 = vld [vmem:[%s1688_s21 + $0x74] ss:$8 sps:$4 sm:$0xff]   ;;  %v1476_v7 = vld [vmem:[%s1688_s21 + $0x70] ss:$8 sps:$4 sm:$0xff]   ;;  %v1477_v24 = vld [vmem:[%s1688_s21 + $0x64] ss:$8 sps:$4 sm:$0xff]   ;;  %s1727_s29 = scalar_lea.vmem %s1835_s8, %s1338_s22  ;;  %s492_s11 = scalar_lea.vmem %s1832_s5, %s1682_s30 }
  0x17   : > { %816 = vmatprep.subr.bf16.mxu1 %v1474_v6  ;;  %v1479_v25 = vld [vmem:[%s1715_s25 + $0x38] sm:$0xff]   ;;  %v1480_v27 = vld [vmem:[%s1688_s21 + $0x60] ss:$8 sps:$4 sm:$0xff]   ;;  %v1483_v29 = vld [vmem:[%s1715_s25 + $0x30] sm:$0xff]   ;;  %s1288_s22 = sshll.u32 %s1682_s30, 1 }
  0x18   : > { %570 = vadd.xlane.f32.xlu0 %v1351_v4  ;;  %817 = vmatpush1.bf16.msra.mxu1 %v1476_v7  ;;  %v1481_v28 = vld [vmem:[%s1688_s21 + $0x54] ss:$8 sps:$4 sm:$0xff]   ;;  %v1484_v30 = vld [vmem:[%s1688_s21 + $0x50] ss:$8 sps:$4 sm:$0xff]   ;;  %v1485_v31 = vld [vmem:[%s1688_s21 + $0x44] ss:$8 sps:$4 sm:$0xff]  }
  0x19   : > { %526 = vadd.xlane.f32.xlu1 %v1677_v5  ;;  %818 = vmatprep.subr.bf16.mxu1 %v1477_v24  ;;  %v1487_v32 = vld [vmem:[%s1715_s25 + $0x28] sm:$0xff]   ;;  %v1489_v34 = vld [vmem:[%s1688_s21 + $0x34] ss:$8 sps:$4 sm:$0xff]   ;;  %v1491_v35 = vld [vmem:[%s1715_s25 + $0x20] sm:$0xff]  }
  0x1a   : > { %1380 = vmatpush3.bf16.msra.mxu0 %v1479_v25  ;;  %v1488_v33 = vld [vmem:[%s1688_s21 + $0x40] ss:$8 sps:$4 sm:$0xff]   ;;  %v1492_v36 = vld [vmem:[%s1688_s21 + $0x30] ss:$8 sps:$4 sm:$0xff]   ;;  %v1493_v37 = vld [vmem:[%s1688_s21 + $0x24] ss:$8 sps:$4 sm:$0xff]  }
  0x1b   : > { %1381 = vmatprep.subr.bf16.mxu0 %v1570_v26  ;;  %v1495_v39 = vld [vmem:[%s1715_s25 + $0x18] sm:$0xff]   ;;  %v1496_v40 = vld [vmem:[%s1688_s21 + $0x20] ss:$8 sps:$4 sm:$0xff]   ;;  %v1499_v42 = vld [vmem:[%s1715_s25 + $0x10] sm:$0xff]  }
  0x1c   : > { %819 = vmatpush1.bf16.msra.mxu1 %v1480_v27  ;;  %v1497_v41 = vld [vmem:[%s1688_s21 + $0x14] ss:$8 sps:$4 sm:$0xff]   ;;  %v1500_v43 = vld [vmem:[%s1688_s21 + $0x10] ss:$8 sps:$4 sm:$0xff]   ;;  %v1501_v44 = vld [vmem:[%s1688_s21 + $0x4] ss:$8 sps:$4 sm:$0xff]  }
  0x1d   : > { %820 = vmatprep.subr.bf16.mxu1 %v1481_v28  ;;  %v1503_v45 = vld [vmem:[%s1715_s25 + $0x8] sm:$0xff]   ;;  %v1505_v47 = vld [vmem:[%s1715_s25] sm:$0xff]   ;;  %s501_s25 = scalar_lea.vmem %s1834_s7, %s1288_s22 }
  0x1e   : > { %1382 = vmatpush3.bf16.msra.mxu0 %v1483_v29  ;;  %v1504_v46 = vld [vmem:[%s1688_s21] ss:$8 sps:$4 sm:$0xff]  }
  0x1f   : > { %1383 = vmatprep.subr.bf16.mxu0 %v1570_v26  ;;  %v1294_v6 = vld [vmem:[%s1830_s3] ss:$0 sm:$0xff] }
  0x20   : > { %821 = vmatpush1.bf16.msra.mxu1 %v1484_v30 }
  0x21   : > { %822 = vmatprep.subr.bf16.mxu1 %v1485_v31 }
  0x22   : > { %1384 = vmatpush3.bf16.msra.mxu0 %v1487_v32 }
  0x23   : > { %1385 = vmatprep.subr.bf16.mxu0 %v1570_v26 }
  0x24   : > { %823 = vmatpush1.bf16.msra.mxu1 %v1488_v33 }
  0x25   : > { %824 = vmatprep.subr.bf16.mxu1 %v1489_v34 }
  0x26   : > { %1386 = vmatpush3.bf16.msra.mxu0 %v1491_v35 }
  0x27   : > { %1387 = vmatprep.subr.bf16.mxu0 %v1570_v26 }
  0x28   : > { %825 = vmatpush1.bf16.msra.mxu1 %v1492_v36  ;;  %v1295_v36 = vld [vmem:[%s492_s11] ss:$0 sm:$0xff] }
  0x29   : > { %826 = vmatprep.subr.bf16.mxu1 %v1493_v37 }
  0x2a   : > { %1388 = vmatpush3.bf16.msra.mxu0 %v1495_v39 }
  0x2b   : > { %1389 = vmatprep.subr.bf16.mxu0 %v1570_v26 }
  0x2c   : > { %827 = vmatpush1.bf16.msra.mxu1 %v1496_v40 }
  0x2d   : > { %828 = vmatprep.subr.bf16.mxu1 %v1497_v41 }
  0x2e   : > { %1390 = vmatpush3.bf16.msra.mxu0 %v1499_v42 }
  0x2f   : > { %1391 = vmatprep.subr.bf16.mxu0 %v1570_v26 }
  0x30   : > { %829 = vmatpush1.bf16.msra.mxu1 %v1500_v43 }
  0x31   : > { %830 = vmatprep.subr.bf16.mxu1 %v1501_v44 }
  0x32   : > { %1392 = vmatpush3.bf16.msra.mxu0 %v1503_v45 }
  0x33   : > { %1393 = vmatprep.subr.bf16.mxu0 %v1570_v26 }
  0x34   : > { %831 = vmatpush1.bf16.msra.mxu1 %v1504_v46 }
  0x35   : > { %1399 = vmatprep.subr.bf16.mxu1 %v1570_v26 }
  0x36   : > { %1394 = vmatpush3.bf16.msra.mxu0 %v1505_v47 }
  0x37   : > { %1411 = vmatprep.subr.bf16.mxu0 %v1570_v26 }
  0x9d   : > { %v569_v8 = vpop.xlane.xlu0 %568 }
  0x9e   : > { %v572_v9 = vmul.f32 0.0078125, %v569_v8  ;;  %v525_v10 = vpop.xlane.xlu1 %524 }
  0x9f   : > { %v529_v11 = vmul.f32 0.0078125, %v525_v10 }
  0xa0   : > { %v1692_v12 = vsub.f32 %v1350_v1, %v572_v9 }
  0xa1   : > { %v571_v13 = vpop.xlane.xlu0 %570  ;;  %v1695_v14 = vsub.f32 %v1674_v3, %v529_v11 }
  0xa2   : > { %v573_v15 = vmul.f32 0.0078125, %v571_v13  ;;  %v576_v16 = vmul.f32 %v1692_v12, %v1692_v12  ;;  %v527_v17 = vpop.xlane.xlu1 %526 }
  0xa3   : > { %v530_v18 = vmul.f32 0.0078125, %v527_v17  ;;  %v533_v20 = vmul.f32 %v1695_v14, %v1695_v14 }
  0xa4   : > { %v1699_v19 = vsub.f32 %v1351_v4, %v573_v15  ;;  %578 = vadd.xlane.f32.xlu0 %v576_v16 }
  0xa5   : > { %v1704_v21 = vsub.f32 %v1677_v5, %v530_v18  ;;  %v726_v18 = vlaneseq }
  0xa6   : > { %v577_v22 = vmul.f32 %v1699_v19, %v1699_v19 }
  0xa7   : > { %v534_v23 = vmul.f32 %v1704_v21, %v1704_v21 }
  0xa8   : > { %580 = vadd.xlane.f32.xlu1 %v577_v22  ;;  %535 = vadd.xlane.f32.xlu0 %v533_v20 }
  0xac   : > { %537 = vadd.xlane.f32.xlu1 %v534_v23 }
 0x12d   : > { %v579_v48 = vpop.xlane.xlu0 %578 }
 0x12e   : > { %v582_v49 = vmul.f32 0.0078125, %v579_v48 }
 0x130   : > { %v584_v50 = vadd.f32 1e-05, %v582_v49 }
 0x131   : > { %v536_v51 = vpop.xlane.xlu0 %535  ;;  %v581_v52 = vpop.xlane.xlu1 %580 }
 0x132   : > { %1514 = vrsqrt.f32 %v584_v50  ;;  %v539_v53 = vmul.f32 0.0078125, %v536_v51  ;;  %v583_v54 = vmul.f32 0.0078125, %v581_v52 }
 0x134   : > { %v541_v55 = vadd.f32 1e-05, %v539_v53  ;;  %v585_v56 = vadd.f32 1e-05, %v583_v54 }
 0x135   : > { %v538_v57 = vpop.xlane.xlu1 %537 }
 0x136   : > { %1516 = vrsqrt.f32 %v541_v55  ;;  %v540_v58 = vmul.f32 0.0078125, %v538_v57 }
 0x137   : > { %1518 = vrsqrt.f32 %v585_v56 }
 0x138   : > { %v542_v59 = vadd.f32 1e-05, %v540_v58 }
 0x13a   : > { %1520 = vrsqrt.f32 %v542_v59 }
 0x13f   : > { %v1515_v60 = vpop.eup %1514 }
 0x140   : > { %v588_v61 = vmul.f32 %v1515_v60, %v1692_v12  ;;  %v1506_v60 = vld [vmem:[%s1727_s29 + $0x38] sm:$0xff]  }
 0x142   : > { %v590_v4 = vmul.f32 %v1293_v62, %v588_v61  ;;  %v1507_v61 = vld [vmem:[%s1727_s29 + $0x30] sm:$0xff]  }
 0x143   : > { %v1517_v63 = vpop.eup %1516 }
 0x144   : > { %v1519_v0 = vpop.eup %1518  ;;  %v545_v1 = vmul.f32 %v1517_v63, %v1695_v14  ;;  %v592_v11 = vadd.f32 %v1294_v6, %v590_v4  ;;  %v1509_v63 = vld [vmem:[%s1727_s29 + $0x20] sm:$0xff]  }
 0x145   : > { %v589_v2 = vmul.f32 %v1519_v0, %v1699_v19  ;;  %v727_v19 = vshrl.u32 %v726_v18, 7  ;;  %v1510_v0 = vld [vmem:[%s1727_s29 + $0x18] sm:$0xff]  }
 0x146   : > { %v553_v10 = vmul.f32 %v1293_v62, %v545_v1  ;;  %v1511_v1 = vld [vmem:[%s1727_s29 + $0x10] sm:$0xff]  }
 0x147   : > { %v1521_v7 = vpop.eup %1520  ;;  %v591_v8 = vmul.f32 %v1293_v62, %v589_v2  ;;  %v728_v20 = vsub.s32 0, %v727_v19  ;;  %v732_v29 = vsub.s32 1, %v727_v19 }
 0x148   : > { %v546_v9 = vmul.f32 %v1521_v7, %v1704_v21  ;;  %v561_v16 = vadd.f32 %v1294_v6, %v553_v10  ;;  %v724_v21 = vld [vmem:[%s501_s25] sm:$0x3] }
 0x149   : > { %v593_v12 = vadd.f32 %v1294_v6, %v591_v8  ;;  %v729_v23 = vrot.slane %v724_v21, %v728_v20  ;;  %v733_v35 = vrot.slane %v724_v21, %v732_v29 }
 0x14a   : > { %v554_v13 = vmul.f32 %v1293_v62, %v546_v9  ;;  %v1508_v62 = vld [vmem:[%s1727_s29 + $0x28] sm:$0xff]  }
 0x14b   : > { %v594_v15 = vpack.c.bf16 %v593_v12, %v592_v11  ;;  %v1512_v11 = vld [vmem:[%s1727_s29 + $0x8] sm:$0xff]   ;;  %v1513_v12 = vld [vmem:[%s1727_s29] sm:$0xff]  }
 0x14c   : > { %v562_v17 = vadd.f32 %v1294_v6, %v554_v13 }
 0x14d   : > { %849 = vmatmul.mubr.bf16.vlgmr.msra.gmra.mxu1 %v594_v15 }
 0x14e   : > { %v563_v14 = vpack.c.bf16 %v562_v17, %v561_v16  ;;  %1401 = vmatprep.mubr.msk.bf16.mxu1 %vm1572_vm0, %v1570_v26 }
 0x150   : > { %1396 = vmatmul.mubr.bf16.vlgmr.msra.gmra.mxu0 %v563_v14 }
 0x151   : > { %1427 = vmatprep.mubr.msk.bf16.mxu0 %vm1572_vm0, %v1570_v26  ;;  %1412 = vmatpush3.bf16.msra.mxu0 %v1506_v60 }
 0x152   : > { %1413 = vmatprep.subr.bf16.mxu0 %v1570_v26 }
 0x155   : > { %1414 = vmatpush3.bf16.msra.mxu0 %v1507_v61 }
 0x156   : > { %1415 = vmatprep.subr.bf16.mxu0 %v1570_v26 }
 0x159   : > { %1416 = vmatpush3.bf16.msra.mxu0 %v1508_v62 }
 0x15a   : > { %1417 = vmatprep.subr.bf16.mxu0 %v1570_v26 }
 0x15d   : > { %1418 = vmatpush3.bf16.msra.mxu0 %v1509_v63 }
 0x15e   : > { %1419 = vmatprep.subr.bf16.mxu0 %v1570_v26 }
 0x161   : > { %1420 = vmatpush3.bf16.msra.mxu0 %v1510_v0 }
 0x162   : > { %1421 = vmatprep.subr.bf16.mxu0 %v1570_v26 }
 0x165   : > { %1422 = vmatpush3.bf16.msra.mxu0 %v1511_v1 }
 0x166   : > { %1423 = vmatprep.subr.bf16.mxu0 %v1570_v26 }
 0x169   : > { %1424 = vmatpush3.bf16.msra.mxu0 %v1512_v11 }
 0x16a   : > { %1425 = vmatprep.subr.bf16.mxu0 %v1570_v26 }
 0x16d   : > { %1426 = vmatpush3.bf16.msra.mxu0 %v1513_v12 }
 0x20d   : > { %v850_v22 = vpop.f32.mrf.mxu1 }
 0x20e   : > { %v851_v28 = vadd.f32 %v850_v22, %v729_v23 }
 0x20f   : > { %v852_v24 = vpop.f32.mrf.mxu1 }
 0x210   : > { %v700_v25 = vpop.f32.mrf.mxu0  ;;  %v853_v41 = vadd.f32 %v852_v24, %v733_v35 }
 0x211   : > { %v854_v27 = vpop.f32.mrf.mxu1  ;;  %v701_v40 = vadd.f32 %v1295_v36, %v700_v25 }
 0x212   : > { %v855_v30 = vadd.f32 %v854_v27, %v729_v23  ;;  %v1397_v31 = vpop.f32.mrf.mxu0 }
 0x213   : > { %v856_v34 = vpop.f32.mrf.mxu1 }
 0x214   : > { %v859_v32 = vpack.c.bf16 %v855_v30, %v851_v28  ;;  %v703_v33 = vpop.f32.mrf.mxu0  ;;  %v857_v39 = vadd.f32 %v856_v34, %v733_v35 }
 0x215   : > { %v704_v38 = vadd.f32 %v1295_v36, %v703_v33 }
 0x216   : > { %1400 = vmatpush3.bf16.xpose.msra.mxu1 %v859_v32  ;;  %v1398_v37 = vpop.f32.mrf.mxu0  ;;  %v860_v43 = vpack.c.bf16 %v857_v39, %v853_v41 }
 0x217   : > { %1405 = vmatprep.subr.bf16.mxu1 %v1570_v26  ;;  %v707_v42 = vpack.c.bf16 %v704_v38, %v701_v40 }
 0x21d   : > { %1402 = vmatmul.mubr.bf16.vlgmr.msra.gmra.mxu1 %v707_v42 }
 0x21e   : > { %1406 = vmatpush3.bf16.msra.mxu1 %v860_v43  ;;  %1407 = vmatprep.mubr.msk.bf16.mxu1 %vm1572_vm0, %v1570_v26 }
 0x2dd   : > { %v895_v44 = vpop.f32.mrf.mxu1 }
 0x2de   : > { %v903_v45 = vsel %vm902_vm1, %v895_v44, -inf }
 0x2df   : > { %904 = vmax.xlane.f32.xlu0 %v903_v45  ;;  %v1403_v46 = vpop.f32.mrf.mxu1 }
 0x2e1   : > { %v898_v47 = vpop.f32.mrf.mxu1 }
 0x2e2   : > { %v906_v48 = vsel %vm902_vm1, %v898_v47, -inf }
 0x2e3   : > { %907 = vmax.xlane.f32.xlu1 %v906_v48  ;;  %v1404_v49 = vpop.f32.mrf.mxu1 }
 0x368   : > { %v905_v50 = vpop.xlane.xlu0 %904 }
 0x369   : > { %v909_v51 = vsub.f32 %v895_v44, %v905_v50 }
 0x36b   : > { %v911_v52 = vmul.f32 1.442695, %v909_v51 }
 0x36c   : > { %v908_v53 = vpop.xlane.xlu1 %907 }
 0x36d   : > { %1522 = vpow2.f32 %v911_v52  ;;  %v910_v54 = vsub.f32 %v898_v47, %v908_v53 }
 0x36f   : > { %v913_v55 = vmul.f32 1.442695, %v910_v54 }
 0x371   : > { %1524 = vpow2.f32 %v913_v55 }
 0x37a   : > { %v1523_v56 = vpop.eup %1522 }
 0x37b   : > { %v915_v57 = vsel %vm902_vm1, %v1523_v56, 0.0 }
 0x37c   : > { %916 = vadd.xlane.f32.xlu0 %v915_v57 }
 0x37e   : > { %v1525_v58 = vpop.eup %1524 }
 0x37f   : > { %v918_v59 = vsel %vm902_vm1, %v1525_v58, 0.0 }
 0x380   : > { %919 = vadd.xlane.f32.xlu1 %v918_v59 }
 0x405   : > { %v917_v2 = vpop.xlane.xlu0 %916 }
 0x406   : > { %1526 = vrcp.f32 %v917_v2 }
 0x409   : > { %v920_v4 = vpop.xlane.xlu1 %919 }
 0x40a   : > { %1528 = vrcp.f32 %v920_v4 }
 0x413   : > { %v1527_v6 = vpop.eup %1526 }
 0x414   : > { %v923_v8 = vmul.f32 %v1527_v6, %v1523_v56 }
 0x417   : > { %v1529_v7 = vpop.eup %1528 }
 0x418   : > { %v924_v9 = vmul.f32 %v1529_v7, %v1525_v58 }
 0x41a   : > { %v925_v10 = vpack.c.bf16 %v924_v9, %v923_v8 }
 0x41c   : > { %1408 = vmatmul.mubr.msk.bf16.vlgmr.msra.gmra.mxu1 %vm902_vm1, %v925_v10 }
 0x4dc   : > { %v963_v13 = vpop.f32.mrf.mxu1 }
 0x4de   : > { %v1409_v15 = vpop.f32.mrf.mxu1 }
 0x4e0   : > { %v966_v16 = vpop.f32.mrf.mxu1 }
 0x4e1   : > { %v970_v17 = vpack.c.bf16 %v966_v16, %v963_v13 }
 0x4e2   : > { %v1410_v14 = vpop.f32.mrf.mxu1 }
 0x4e3   : > { %1428 = vmatmul.mubr.bf16.vlgmr.msra.gmra.mxu0 %v970_v17 }
 0x5a3   : > { %v1069_v18 = vpop.f32.mrf.mxu0 }
 0x5a5   : > { %v1429_v19 = vpop.f32.mrf.mxu0  ;;  %1079 = sbr.rel (%p1329_p7) target bundleno = 1454 (0x5ae), region = 64 }
 0x5a7   : > { %v1072_v20 = vpop.f32.mrf.mxu0 }
 0x5a9   : > { %v1430_v21 = vpop.f32.mrf.mxu0 }
 0x5aa   : > { %v1330_v22 = vld [vmem:[%s1836_s9] ss:$0 sm:$0xff] }
 0x5ab   : > { %v1087_v26 = vadd.f32 %v1674_v3, %v1330_v22  ;;  %v1088_v23 = vadd.f32 %v1677_v5, %v1330_v22 }
 0x5ad   : > { %1089 = vst [vmem:[#allocation2] sm:$0xff] %v1087_v26  ;;  %1090 = vst [vmem:[#allocation2 + $0x8] sm:$0xff] %v1088_v23 }
 0x5ae PF: > { %p1331_p8 = scmp.ne.s32.totalorder %s1552_s13, 3 }
 0x5b3   : > { %1100 = sbr.rel (%p1331_p8) target bundleno = 1474 (0x5c2), region = 68 }
 0x5b4   : > { %v1091_v24 = vld [vmem:[#allocation2] sm:$0xff]  ;;  %v1092_v25 = vld [vmem:[#allocation2 + $0x8] sm:$0xff] }
 0x5b5   : > { %v1093_v27 = vadd.f32 %v1091_v24, %v1069_v18  ;;  %v1094_v28 = vadd.f32 %v1092_v25, %v1072_v20 }
 0x5b7   : > { %1095 = vst [vmem:[#allocation2] sm:$0xff] %v1093_v27  ;;  %1096 = vst [vmem:[#allocation2 + $0x8] sm:$0xff] %v1094_v28 }
 0x5be   : > { %v1101_v29 = vld [vmem:[#allocation2] sm:$0xff]  ;;  %v1102_v30 = vld [vmem:[#allocation2 + $0x8] sm:$0xff] }
 0x5bf   : > { %v1355_v31 = vpack.c.bf16 %v1102_v30, %v1101_v29 }
 0x5c1   : > { %1356 = vst [vmem:[%s515_s26] sm:$0xff] %v1355_v31  }
 0x5c2 PF: > { %s20_s17 = sadd.s32 1, %s1568_s17   ;;  %s1838_s13 = smov %s1560_s15 }
 0x5c3   : > { %p17_p9 = scmp.ge.s32.totalorder %s20_s17, 10   ;;  %s1839_s14 = smov %s1564_s16 }
 0x5c4   : > { %s1840_s15 = smov %s1843_s18  ;;  %s1841_s16 = smov %s1847_s19 }
 0x5c5   :  { %19 = sbr.rel (!%p17_p9) target bundleno = 3 (0x3), region = 116 }

</bundles_post_ra>
